<compile_context>
chip_gen: v7x
topology: tpu7x:2x2x1
jax: 0.10.0
libtpu: 0.0.40
codegen_flags: <defaults>
</compile_context>

<pallas_src>
import functools

import numpy as np
import jax
import jax.numpy as jnp
from jax.experimental import pallas as pl
from jax.experimental.pallas import tpu as pltpu

BN_EPS = 1e-5


def _round_up(x, m):
    return (x + m - 1) // m * m


# --------------------------------------------------------------------------
# Fused kernel: MLP weight generator + dynamic conv net (single pallas_call)
# --------------------------------------------------------------------------
def _fused_kernel(num_kernels, kernel_sizes, in_ch, mlp_in_dims, row_base,
                  N, H, W, cpad, *refs):
    L = len(num_kernels)
    n_mlp = len(mlp_in_dims)
    NHW = N * H * W
    cin0 = in_ch[0]

    idx = 0
    meta_ref = refs[idx]; idx += 1
    wb_refs = refs[idx:idx + n_mlp]; idx += n_mlp       # (din+1, dout): W rows + bias row
    xc_ref = refs[idx]; idx += 1                        # (cin0+2, NHW): activations + y/x coords
    bn_ref = refs[idx]; idx += 1                        # (2*sum(bn channels), 1)
    o_ref = refs[idx]; idx += 1                         # (cout_last, NHW)
    w_scr = refs[idx]; idx += 1                         # VMEM (rows_pad, cpad): one c_out per row
    tap_scr = refs[idx]; idx += 1                       # VMEM (cpad, NHW): im2col tap stack

    # ---- KernelGeneratorMLP: relu(h @ W + b) chain, last layer linear ------
    h = meta_ref[...]
    for m in range(n_mlp):
        din = mlp_in_dims[m]
        w = wb_refs[m][0:din, :]
        b = wb_refs[m][din:din + 1, :]
        h = jnp.dot(h, w, preferred_element_type=jnp.float32) + b
        if m < n_mlp - 1:
            h = jnp.maximum(h, 0.0)

    # ---- Unpack generated weights: aligned 128-wide copies, one per c_out ---
    j = 0
    for l in range(L):
        for co in range(num_kernels[l]):
            r = row_base[l] + co
            w_scr[r:r + 1, :] = h[:, j * cpad:(j + 1) * cpad]
            j += 1

    # ---- Border masks: one per unique (oy, ox) offset, shared across layers -
    y_f = xc_ref[cin0:cin0 + 1, :]                      # (1, NHW) row index within image
    x_f = xc_ref[cin0 + 1:cin0 + 2, :]                  # (1, NHW) col index within image

    def _and(a, b):
        return b if a is None else jnp.logical_and(a, b)

    masks = {}
    for K in sorted(set(kernel_sizes)):
        p = K // 2
        for ky in range(K):
            for kx in range(K):
                oy, ox = ky - p, kx - p
                if (oy == 0 and ox == 0) or (oy, ox) in masks:
                    continue
                cond = None
                if oy < 0:
                    cond = _and(cond, y_f >= float(-oy))
                elif oy > 0:
                    cond = _and(cond, y_f < float(H - oy))
                if ox < 0:
                    cond = _and(cond, x_f >= float(-ox))
                elif ox > 0:
                    cond = _and(cond, x_f < float(W - ox))
                masks[(oy, ox)] = cond.astype(jnp.float32)

    # ---- DynamicConvNet: im2col-in-VMEM + one MXU matmul per layer ----------
    # Zero-init once: rows >= kkc of any layer stay zero (and the matching
    # weight columns are zero-padded anyway), so the full-cpad contraction is exact.
    tap_scr[...] = jnp.zeros((cpad, NHW), jnp.float32)

    act = xc_ref[0:cin0, :]                              # (cin, NHW) lane-dense activations
    bn_off = 0
    for l in range(L):
        cin, cout, K = in_ch[l], num_kernels[l], kernel_sizes[l]
        p = K // 2
        for ky in range(K):
            for kx in range(K):
                t = ky * K + kx
                oy, ox = ky - p, kx - p
                d = oy * W + ox                          # flat-index shift
                if d == 0:
                    src = act                            # center tap: no shift, no mask
                else:
                    src = pltpu.roll(act, shift=(-d) % NHW, axis=1) * masks[(oy, ox)]
                tap_scr[t * cin:(t + 1) * cin, :] = src

        w_tile = w_scr[row_base[l]:row_base[l] + cout, :]            # (cout, cpad)
        acc = jnp.dot(w_tile, tap_scr[...], preferred_element_type=jnp.float32)

        if l < L - 1:
            gamma = bn_ref[bn_off:bn_off + cout, :]                  # (cout, 1)
            beta = bn_ref[bn_off + cout:bn_off + 2 * cout, :]
            bn_off += 2 * cout
            inv_n = 1.0 / NHW
            mean = jnp.sum(acc, axis=1, keepdims=True) * inv_n       # one-pass stats
            ex2 = jnp.sum(acc * acc, axis=1, keepdims=True) * inv_n
            var = jnp.maximum(ex2 - mean * mean, 0.0)                # cancellation guard
            scale = gamma * jax.lax.rsqrt(var + BN_EPS)
            shift = beta - mean * scale
            act = jnp.maximum(acc * scale + shift, 0.0)
        else:
            act = jnp.tanh(acc)

    o_ref[...] = act                                                 # (cout_last, NHW)


# --------------------------------------------------------------------------
# Full DynamicModel forward (single pallas_call)
# --------------------------------------------------------------------------
def dynamic_model_forward(params, x_metadata, x, num_kernels, kernel_sizes):
    num_kernels = [int(c) for c in num_kernels]
    kernel_sizes = [int(k) for k in kernel_sizes]
    L = len(num_kernels)
    assert all(k % 2 == 1 for k in kernel_sizes), "'same' padding assumes odd K"

    N, cin0, H, W = x.shape
    NHW = N * H * W
    in_ch = [cin0] + num_kernels[:-1]
    kkc = [k * k * c for k, c in zip(kernel_sizes, in_ch)]
    cpad = _round_up(max(kkc), 128)                      # padded contraction width per c_out

    # Per-layer row bases in the weight scratch, 8-sublane aligned.
    row_base, rb = [], 0
    for c in num_kernels:
        row_base.append(rb)
        rb += _round_up(c, 8)
    wscr_rows = _round_up(rb, 8)

    # ---- Pad + permute last MLP layer columns so each (layer, c_out) weight
    #      row is a zero-padded 128-aligned block of cpad columns in
    #      (ky, kx, c_in) order (matches im2col row order in the kernel). -----
    n_rows = sum(num_kernels)
    padded_total = n_rows * cpad
    src_cols, dst_cols = [], []
    off, blk = 0, 0
    for cout, cin, K in zip(num_kernels, in_ch, kernel_sizes):
        for co in range(cout):
            for ky in range(K):
                for kx in range(K):
                    for ci in range(cin):
                        src_cols.append(off + ((co * cin + ci) * K + ky) * K + kx)
                        dst_cols.append(blk * cpad + (ky * K + kx) * cin + ci)
            blk += 1
        off += cout * cin * K * K
    src_cols = np.asarray(src_cols, np.int32)
    dst_cols = np.asarray(dst_cols, np.int32)

    mlp_w = list(params["mlp_w"])
    mlp_b = list(params["mlp_b"])
    assert mlp_w[-1].shape[1] == off, "last MLP layer width mismatch"
    w_pad = jnp.zeros((mlp_w[-1].shape[0], padded_total), jnp.float32)
    w_pad = w_pad.at[:, dst_cols].set(mlp_w[-1][:, src_cols])
    b_pad = jnp.zeros((1, padded_total), jnp.float32)
    b_pad = b_pad.at[:, dst_cols].set(mlp_b[-1][:, src_cols])
    mlp_w[-1], mlp_b[-1] = w_pad, b_pad

    # ---- Coalesce each MLP (W, b) pair into one buffer (bias = extra row) ---
    wb = [jnp.concatenate([w_, b_], axis=0) for w_, b_ in zip(mlp_w, mlp_b)]
    mlp_in_dims = tuple(int(w_.shape[0]) for w_ in mlp_w)

    # ---- Coalesce all BN gamma/beta into one (2*sum(C), 1) buffer -----------
    if L > 1:
        parts = []
        for g, b_ in zip(params["bn_gamma"], params["bn_beta"]):
            parts.append(g.reshape(-1, 1).astype(jnp.float32))
            parts.append(b_.reshape(-1, 1).astype(jnp.float32))
        bn_all = jnp.concatenate(parts, axis=0)
    else:
        bn_all = jnp.zeros((1, 1), jnp.float32)          # placeholder (unused)

    # ---- Lane-dense activations (C, N*H*W) + exact y/x coordinate planes ----
    if cin0 == 1:
        x_flat = x.reshape(1, NHW)
    else:
        x_flat = jnp.transpose(x, (1, 0, 2, 3)).reshape(cin0, NHW)
    f = np.arange(NHW)
    coords = np.stack([((f // W) % H).astype(np.float32),
                       (f % W).astype(np.float32)], axis=0)
    xc = jnp.concatenate([x_flat.astype(jnp.float32), jnp.asarray(coords)], axis=0)

    args = [x_metadata] + wb + [xc, bn_all]

    kernel = functools.partial(
        _fused_kernel, tuple(num_kernels), tuple(kernel_sizes), tuple(in_ch),
        mlp_in_dims, tuple(row_base), N, H, W, cpad)

    # Advisory cost estimate so XLA can schedule the surrounding glue.
    mlp_dims = [int(x_metadata.shape[-1])] + [int(w_.shape[1]) for w_ in mlp_w]
    flops = sum(2 * mlp_dims[i] * mlp_dims[i + 1] for i in range(len(mlp_dims) - 1))
    flops += sum(2 * c * cpad * NHW for c in num_kernels)
    transcend = num_kernels[-1] * NHW + 2 * sum(num_kernels[:-1])
    bytes_acc = sum(int(np.prod(a.shape)) * 4 for a in args) + num_kernels[-1] * NHW * 4

    out = pl.pallas_call(
        kernel,
        out_shape=jax.ShapeDtypeStruct((num_kernels[-1], NHW), jnp.float32),
        in_specs=[pl.BlockSpec(memory_space=pltpu.MemorySpace.VMEM)] * len(args),
        out_specs=pl.BlockSpec(memory_space=pltpu.MemorySpace.VMEM),
        scratch_shapes=[pltpu.VMEM((wscr_rows, cpad), jnp.float32),    # generated weights
                        pltpu.VMEM((cpad, NHW), jnp.float32)],         # im2col tap stack
        cost_estimate=pl.CostEstimate(flops=int(flops),
                                      transcendentals=int(transcend),
                                      bytes_accessed=int(bytes_acc)),
    )(*args)

    # (Cout, N*H*W) -> NCHW.  Cout_last == 1 here, so this is a pure reshape.
    out = out.reshape(num_kernels[-1], N, H, W)
    if num_kernels[-1] == 1:
        return out.reshape(N, 1, H, W)
    return jnp.transpose(out, (1, 0, 2, 3))


# --------------------------------------------------------------------------
# Deterministic parameter init (PyTorch-style U(-1/sqrt(fan_in), 1/sqrt(fan_in)))
# --------------------------------------------------------------------------
def init_params(key, input_dim, hidden_dim, num_kernels, kernel_sizes):
    in_ch = [1] + list(num_kernels[:-1])
    total = sum(k * k * c * n for k, c, n in zip(kernel_sizes, in_ch, num_kernels))
    dims = [input_dim] + list(hidden_dim) + [total]

    mlp_w, mlp_b = [], []
    for i in range(len(dims) - 1):
        key, kw, kb = jax.random.split(key, 3)
        bound = float(dims[i]) ** -0.5
        mlp_w.append(jax.random.uniform(kw, (dims[i], dims[i + 1]), jnp.float32,
                                        -bound, bound))
        mlp_b.append(jax.random.uniform(kb, (1, dims[i + 1]), jnp.float32,
                                        -bound, bound))

    bn_gamma = [jnp.ones((c,), jnp.float32) for c in num_kernels[:-1]]
    bn_beta = [jnp.zeros((c,), jnp.float32) for c in num_kernels[:-1]]
    return {"mlp_w": mlp_w, "mlp_b": mlp_b, "bn_gamma": bn_gamma, "bn_beta": bn_beta}


# --------------------------------------------------------------------------
# Pure-JAX reference (mirrors the PyTorch forward) for verification
# --------------------------------------------------------------------------
def reference_forward(params, x_metadata, x, num_kernels, kernel_sizes):
    h = x_metadata
    ws, bs = params["mlp_w"], params["mlp_b"]
    for i, (w, b) in enumerate(zip(ws, bs)):
        h = h @ w + b
        if i < len(ws) - 1:
            h = jax.nn.relu(h)
    flat = h.reshape(-1)

    in_ch = [1] + list(num_kernels[:-1])
    layer_weights = []
    off = 0
    for cout, cin, K in zip(num_kernels, in_ch, kernel_sizes):
        n = cout * cin * K * K
        layer_weights.append(flat[off:off + n].reshape(cout, cin, K, K))
        off += n

    act = x
    L = len(num_kernels)
    for l in range(L):
        act = jax.lax.conv_general_dilated(
            act, layer_weights[l], window_strides=(1, 1), padding="SAME",
            dimension_numbers=("NCHW", "OIHW", "NCHW"))
        if l < L - 1:
            g = params["bn_gamma"][l].reshape(1, -1, 1, 1)
            b = params["bn_beta"][l].reshape(1, -1, 1, 1)
            mean = jnp.mean(act, axis=(0, 2, 3), keepdims=True)
            var = jnp.mean((act - mean) ** 2, axis=(0, 2, 3), keepdims=True)
            act = jax.nn.relu((act - mean) * jax.lax.rsqrt(var + BN_EPS) * g + b)
        else:
            act = jnp.tanh(act)
    return act


if __name__ == "__main__":
    # Small config consistent with the module's constructor:
    input_dim = 8
    hidden_dim = [16, 32]
    num_kernels = [4, 8, 1]
    kernel_sizes = [3, 3, 3]
    in_channels = 1  # DynamicConvNet's first generated kernel is viewed with 1 input channel

    key = jax.random.PRNGKey(0)
    key, km, kx = jax.random.split(key, 3)
    params = init_params(key, input_dim, hidden_dim, num_kernels, kernel_sizes)

    x_metadata = jax.random.normal(km, (1, input_dim), jnp.float32)
    x = jax.random.normal(kx, (2, in_channels, 16, 16), jnp.float32)

    out = dynamic_model_forward(params, x_metadata, x, num_kernels, kernel_sizes)
    out = jax.block_until_ready(out)

    assert out.shape == (2, num_kernels[-1], 16, 16)
    assert bool(jnp.all(jnp.isfinite(out)))

    ref = reference_forward(params, x_metadata, x, num_kernels, kernel_sizes)
    max_err = float(jnp.max(jnp.abs(out - ref)))
    assert max_err < 5e-2, f"max abs err {max_err}"

    # TODO(synk): BatchNorm running-mean/var updates (training-time side effect) are not
    # materialized; even kernel sizes (PyTorch asymmetric 'same' pad) are unsupported.
    print("KERNEL_OK")
</pallas_src>

<mosaic_0001>
module attributes {stable_mosaic.version = 11 : i64} {
  func.func @_fused_kernel(%arg0: memref<1x8xf32, #tpu.memory_space<vmem>>, %arg1: memref<9x16xf32, #tpu.memory_space<vmem>>, %arg2: memref<17x32xf32, #tpu.memory_space<vmem>>, %arg3: memref<33x1664xf32, #tpu.memory_space<vmem>>, %arg4: memref<3x512xf32, #tpu.memory_space<vmem>>, %arg5: memref<24x1xf32, #tpu.memory_space<vmem>>, %arg6: memref<1x512xf32, #tpu.memory_space<vmem>>, %arg7: memref<24x128xf32, #tpu.memory_space<vmem>>, %arg8: memref<128x512xf32, #tpu.memory_space<vmem>>) attributes {dimension_semantics = [], scalar_prefetch = 0 : i64, scratch_operands = 2 : i64, tpu.core_type = #tpu.core_type<tc>} {
    %c0 = arith.constant 0 : index
    %c0_0 = arith.constant 0 : index
    %0 = vector.load %arg0[%c0, %c0_0] : memref<1x8xf32, #tpu.memory_space<vmem>>, vector<1x8xf32>
    %c0_1 = arith.constant 0 : index
    %c0_2 = arith.constant 0 : index
    %1 = vector.load %arg1[%c0_1, %c0_2] : memref<9x16xf32, #tpu.memory_space<vmem>>, vector<8x16xf32>
    %c8 = arith.constant 8 : index
    %c0_3 = arith.constant 0 : index
    %2 = vector.load %arg1[%c8, %c0_3] : memref<9x16xf32, #tpu.memory_space<vmem>>, vector<1x16xf32>
    %cst = arith.constant dense<0.000000e+00> : vector<1x16xf32>
    %3 = tpu.matmul %0, %1, %cst {dimension_numbers = #tpu.dot_dimension_numbers<[1], [0], [0], [1], [0, 0, 1, 1], [], []>} : vector<1x8xf32>, vector<8x16xf32>, vector<1x16xf32> -> vector<1x16xf32>
    %4 = arith.addf %3, %2 : vector<1x16xf32>
    %cst_4 = arith.constant 0.000000e+00 : f32
    %5 = vector.broadcast %cst_4 : f32 to vector<1x16xf32>
    %6 = arith.maximumf %4, %5 : vector<1x16xf32>
    %c0_5 = arith.constant 0 : index
    %c0_6 = arith.constant 0 : index
    %7 = vector.load %arg2[%c0_5, %c0_6] : memref<17x32xf32, #tpu.memory_space<vmem>>, vector<16x32xf32>
    %c16 = arith.constant 16 : index
    %c0_7 = arith.constant 0 : index
    %8 = vector.load %arg2[%c16, %c0_7] : memref<17x32xf32, #tpu.memory_space<vmem>>, vector<1x32xf32>
    %cst_8 = arith.constant dense<0.000000e+00> : vector<1x32xf32>
    %9 = tpu.matmul %6, %7, %cst_8 {dimension_numbers = #tpu.dot_dimension_numbers<[1], [0], [0], [1], [0, 0, 1, 1], [], []>} : vector<1x16xf32>, vector<16x32xf32>, vector<1x32xf32> -> vector<1x32xf32>
    %10 = arith.addf %9, %8 : vector<1x32xf32>
    %cst_9 = arith.constant 0.000000e+00 : f32
    %11 = vector.broadcast %cst_9 : f32 to vector<1x32xf32>
    %12 = arith.maximumf %10, %11 : vector<1x32xf32>
    %c0_10 = arith.constant 0 : index
    %c0_11 = arith.constant 0 : index
    %13 = vector.load %arg3[%c0_10, %c0_11] : memref<33x1664xf32, #tpu.memory_space<vmem>>, vector<32x1664xf32>
    %c32 = arith.constant 32 : index
    %c0_12 = arith.constant 0 : index
    %14 = vector.load %arg3[%c32, %c0_12] : memref<33x1664xf32, #tpu.memory_space<vmem>>, vector<1x1664xf32>
    %cst_13 = arith.constant dense<0.000000e+00> : vector<1x1664xf32>
    %15 = tpu.matmul %12, %13, %cst_13 {dimension_numbers = #tpu.dot_dimension_numbers<[1], [0], [0], [1], [0, 0, 1, 1], [], []>} : vector<1x32xf32>, vector<32x1664xf32>, vector<1x1664xf32> -> vector<1x1664xf32>
    %16 = arith.addf %15, %14 : vector<1x1664xf32>
    %17 = vector.extract_strided_slice %16 {offsets = [0, 0], sizes = [1, 128], strides = [1, 1]} : vector<1x1664xf32> to vector<1x128xf32>
    %c0_14 = arith.constant 0 : index
    %c0_15 = arith.constant 0 : index
    %18 = vector.load %arg7[%c0_14, %c0_15] : memref<24x128xf32, #tpu.memory_space<vmem>>, vector<1x128xf32>
    tpu.vector_store %arg7[%c0_14, %c0_15], %17 {strides = array<i32>} : memref<24x128xf32, #tpu.memory_space<vmem>>, vector<1x128xf32>,
    %19 = vector.extract_strided_slice %16 {offsets = [0, 128], sizes = [1, 128], strides = [1, 1]} : vector<1x1664xf32> to vector<1x128xf32>
    %c1 = arith.constant 1 : index
    %c0_16 = arith.constant 0 : index
    %20 = vector.load %arg7[%c1, %c0_16] : memref<24x128xf32, #tpu.memory_space<vmem>>, vector<1x128xf32>
    tpu.vector_store %arg7[%c1, %c0_16], %19 {strides = array<i32>} : memref<24x128xf32, #tpu.memory_space<vmem>>, vector<1x128xf32>,
    %21 = vector.extract_strided_slice %16 {offsets = [0, 256], sizes = [1, 128], strides = [1, 1]} : vector<1x1664xf32> to vector<1x128xf32>
    %c2 = arith.constant 2 : index
    %c0_17 = arith.constant 0 : index
    %22 = vector.load %arg7[%c2, %c0_17] : memref<24x128xf32, #tpu.memory_space<vmem>>, vector<1x128xf32>
    tpu.vector_store %arg7[%c2, %c0_17], %21 {strides = array<i32>} : memref<24x128xf32, #tpu.memory_space<vmem>>, vector<1x128xf32>,
    %23 = vector.extract_strided_slice %16 {offsets = [0, 384], sizes = [1, 128], strides = [1, 1]} : vector<1x1664xf32> to vector<1x128xf32>
    %c3 = arith.constant 3 : index
    %c0_18 = arith.constant 0 : index
    %24 = vector.load %arg7[%c3, %c0_18] : memref<24x128xf32, #tpu.memory_space<vmem>>, vector<1x128xf32>
    tpu.vector_store %arg7[%c3, %c0_18], %23 {strides = array<i32>} : memref<24x128xf32, #tpu.memory_space<vmem>>, vector<1x128xf32>,
    %25 = vector.extract_strided_slice %16 {offsets = [0, 512], sizes = [1, 128], strides = [1, 1]} : vector<1x1664xf32> to vector<1x128xf32>
    %c8_19 = arith.constant 8 : index
    %c0_20 = arith.constant 0 : index
    %26 = vector.load %arg7[%c8_19, %c0_20] : memref<24x128xf32, #tpu.memory_space<vmem>>, vector<1x128xf32>
    tpu.vector_store %arg7[%c8_19, %c0_20], %25 {strides = array<i32>} : memref<24x128xf32, #tpu.memory_space<vmem>>, vector<1x128xf32>,
    %27 = vector.extract_strided_slice %16 {offsets = [0, 640], sizes = [1, 128], strides = [1, 1]} : vector<1x1664xf32> to vector<1x128xf32>
    %c9 = arith.constant 9 : index
    %c0_21 = arith.constant 0 : index
    %28 = vector.load %arg7[%c9, %c0_21] : memref<24x128xf32, #tpu.memory_space<vmem>>, vector<1x128xf32>
    tpu.vector_store %arg7[%c9, %c0_21], %27 {strides = array<i32>} : memref<24x128xf32, #tpu.memory_space<vmem>>, vector<1x128xf32>,
    %29 = vector.extract_strided_slice %16 {offsets = [0, 768], sizes = [1, 128], strides = [1, 1]} : vector<1x1664xf32> to vector<1x128xf32>
    %c10 = arith.constant 10 : index
    %c0_22 = arith.constant 0 : index
    %30 = vector.load %arg7[%c10, %c0_22] : memref<24x128xf32, #tpu.memory_space<vmem>>, vector<1x128xf32>
    tpu.vector_store %arg7[%c10, %c0_22], %29 {strides = array<i32>} : memref<24x128xf32, #tpu.memory_space<vmem>>, vector<1x128xf32>,
    %31 = vector.extract_strided_slice %16 {offsets = [0, 896], sizes = [1, 128], strides = [1, 1]} : vector<1x1664xf32> to vector<1x128xf32>
    %c11 = arith.constant 11 : index
    %c0_23 = arith.constant 0 : index
    %32 = vector.load %arg7[%c11, %c0_23] : memref<24x128xf32, #tpu.memory_space<vmem>>, vector<1x128xf32>
    tpu.vector_store %arg7[%c11, %c0_23], %31 {strides = array<i32>} : memref<24x128xf32, #tpu.memory_space<vmem>>, vector<1x128xf32>,
    %33 = vector.extract_strided_slice %16 {offsets = [0, 1024], sizes = [1, 128], strides = [1, 1]} : vector<1x1664xf32> to vector<1x128xf32>
    %c12 = arith.constant 12 : index
    %c0_24 = arith.constant 0 : index
    %34 = vector.load %arg7[%c12, %c0_24] : memref<24x128xf32, #tpu.memory_space<vmem>>, vector<1x128xf32>
    tpu.vector_store %arg7[%c12, %c0_24], %33 {strides = array<i32>} : memref<24x128xf32, #tpu.memory_space<vmem>>, vector<1x128xf32>,
    %35 = vector.extract_strided_slice %16 {offsets = [0, 1152], sizes = [1, 128], strides = [1, 1]} : vector<1x1664xf32> to vector<1x128xf32>
    %c13 = arith.constant 13 : index
    %c0_25 = arith.constant 0 : index
    %36 = vector.load %arg7[%c13, %c0_25] : memref<24x128xf32, #tpu.memory_space<vmem>>, vector<1x128xf32>
    tpu.vector_store %arg7[%c13, %c0_25], %35 {strides = array<i32>} : memref<24x128xf32, #tpu.memory_space<vmem>>, vector<1x128xf32>,
    %37 = vector.extract_strided_slice %16 {offsets = [0, 1280], sizes = [1, 128], strides = [1, 1]} : vector<1x1664xf32> to vector<1x128xf32>
    %c14 = arith.constant 14 : index
    %c0_26 = arith.constant 0 : index
    %38 = vector.load %arg7[%c14, %c0_26] : memref<24x128xf32, #tpu.memory_space<vmem>>, vector<1x128xf32>
    tpu.vector_store %arg7[%c14, %c0_26], %37 {strides = array<i32>} : memref<24x128xf32, #tpu.memory_space<vmem>>, vector<1x128xf32>,
    %39 = vector.extract_strided_slice %16 {offsets = [0, 1408], sizes = [1, 128], strides = [1, 1]} : vector<1x1664xf32> to vector<1x128xf32>
    %c15 = arith.constant 15 : index
    %c0_27 = arith.constant 0 : index
    %40 = vector.load %arg7[%c15, %c0_27] : memref<24x128xf32, #tpu.memory_space<vmem>>, vector<1x128xf32>
    tpu.vector_store %arg7[%c15, %c0_27], %39 {strides = array<i32>} : memref<24x128xf32, #tpu.memory_space<vmem>>, vector<1x128xf32>,
    %41 = vector.extract_strided_slice %16 {offsets = [0, 1536], sizes = [1, 128], strides = [1, 1]} : vector<1x1664xf32> to vector<1x128xf32>
    %c16_28 = arith.constant 16 : index
    %c0_29 = arith.constant 0 : index
    %42 = vector.load %arg7[%c16_28, %c0_29] : memref<24x128xf32, #tpu.memory_space<vmem>>, vector<1x128xf32>
    tpu.vector_store %arg7[%c16_28, %c0_29], %41 {strides = array<i32>} : memref<24x128xf32, #tpu.memory_space<vmem>>, vector<1x128xf32>,
    %c1_30 = arith.constant 1 : index
    %c0_31 = arith.constant 0 : index
    %43 = vector.load %arg4[%c1_30, %c0_31] : memref<3x512xf32, #tpu.memory_space<vmem>>, vector<1x512xf32>
    %c2_32 = arith.constant 2 : index
    %c0_33 = arith.constant 0 : index
    %44 = vector.load %arg4[%c2_32, %c0_33] : memref<3x512xf32, #tpu.memory_space<vmem>>, vector<1x512xf32>
    %cst_34 = arith.constant 1.000000e+00 : f32
    %45 = vector.broadcast %cst_34 : f32 to vector<1x512xf32>
    %46 = arith.cmpf oge, %43, %45 : vector<1x512xf32>
    %cst_35 = arith.constant 1.000000e+00 : f32
    %47 = vector.broadcast %cst_35 : f32 to vector<1x512xf32>
    %48 = arith.cmpf oge, %44, %47 : vector<1x512xf32>
    %49 = arith.andi %46, %48 : vector<1x512xi1>
    %50 = arith.extui %49 : vector<1x512xi1> to vector<1x512xi32>
    %51 = arith.sitofp %50 : vector<1x512xi32> to vector<1x512xf32>
    %cst_36 = arith.constant 1.000000e+00 : f32
    %52 = vector.broadcast %cst_36 : f32 to vector<1x512xf32>
    %53 = arith.cmpf oge, %43, %52 : vector<1x512xf32>
    %54 = arith.extui %53 : vector<1x512xi1> to vector<1x512xi32>
    %55 = arith.sitofp %54 : vector<1x512xi32> to vector<1x512xf32>
    %cst_37 = arith.constant 1.000000e+00 : f32
    %56 = vector.broadcast %cst_37 : f32 to vector<1x512xf32>
    %57 = arith.cmpf oge, %43, %56 : vector<1x512xf32>
    %cst_38 = arith.constant 1.500000e+01 : f32
    %58 = vector.broadcast %cst_38 : f32 to vector<1x512xf32>
    %59 = arith.cmpf olt, %44, %58 : vector<1x512xf32>
    %60 = arith.andi %57, %59 : vector<1x512xi1>
    %61 = arith.extui %60 : vector<1x512xi1> to vector<1x512xi32>
    %62 = arith.sitofp %61 : vector<1x512xi32> to vector<1x512xf32>
    %cst_39 = arith.constant 1.000000e+00 : f32
    %63 = vector.broadcast %cst_39 : f32 to vector<1x512xf32>
    %64 = arith.cmpf oge, %44, %63 : vector<1x512xf32>
    %65 = arith.extui %64 : vector<1x512xi1> to vector<1x512xi32>
    %66 = arith.sitofp %65 : vector<1x512xi32> to vector<1x512xf32>
    %cst_40 = arith.constant 1.500000e+01 : f32
    %67 = vector.broadcast %cst_40 : f32 to vector<1x512xf32>
    %68 = arith.cmpf olt, %44, %67 : vector<1x512xf32>
    %69 = arith.extui %68 : vector<1x512xi1> to vector<1x512xi32>
    %70 = arith.sitofp %69 : vector<1x512xi32> to vector<1x512xf32>
    %cst_41 = arith.constant 1.500000e+01 : f32
    %71 = vector.broadcast %cst_41 : f32 to vector<1x512xf32>
    %72 = arith.cmpf olt, %43, %71 : vector<1x512xf32>
    %cst_42 = arith.constant 1.000000e+00 : f32
    %73 = vector.broadcast %cst_42 : f32 to vector<1x512xf32>
    %74 = arith.cmpf oge, %44, %73 : vector<1x512xf32>
    %75 = arith.andi %72, %74 : vector<1x512xi1>
    %76 = arith.extui %75 : vector<1x512xi1> to vector<1x512xi32>
    %77 = arith.sitofp %76 : vector<1x512xi32> to vector<1x512xf32>
    %cst_43 = arith.constant 1.500000e+01 : f32
    %78 = vector.broadcast %cst_43 : f32 to vector<1x512xf32>
    %79 = arith.cmpf olt, %43, %78 : vector<1x512xf32>
    %80 = arith.extui %79 : vector<1x512xi1> to vector<1x512xi32>
    %81 = arith.sitofp %80 : vector<1x512xi32> to vector<1x512xf32>
    %cst_44 = arith.constant 1.500000e+01 : f32
    %82 = vector.broadcast %cst_44 : f32 to vector<1x512xf32>
    %83 = arith.cmpf olt, %43, %82 : vector<1x512xf32>
    %cst_45 = arith.constant 1.500000e+01 : f32
    %84 = vector.broadcast %cst_45 : f32 to vector<1x512xf32>
    %85 = arith.cmpf olt, %44, %84 : vector<1x512xf32>
    %86 = arith.andi %83, %85 : vector<1x512xi1>
    %87 = arith.extui %86 : vector<1x512xi1> to vector<1x512xi32>
    %88 = arith.sitofp %87 : vector<1x512xi32> to vector<1x512xf32>
    %cst_46 = arith.constant 0.000000e+00 : f32
    %89 = vector.broadcast %cst_46 : f32 to vector<128x512xf32>
    %c0_47 = arith.constant 0 : index
    %c0_48 = arith.constant 0 : index
    %90 = vector.load %arg8[%c0_47, %c0_48] : memref<128x512xf32, #tpu.memory_space<vmem>>, vector<128x512xf32>
    tpu.vector_store %arg8[%c0_47, %c0_48], %89 {strides = array<i32>} : memref<128x512xf32, #tpu.memory_space<vmem>>, vector<128x512xf32>,
    %c0_49 = arith.constant 0 : index
    %c0_50 = arith.constant 0 : index
    %91 = vector.load %arg4[%c0_49, %c0_50] : memref<3x512xf32, #tpu.memory_space<vmem>>, vector<1x512xf32>
    %c17_i32 = arith.constant 17 : i32
    %92 = tpu.dynamic_rotate %91 by %c17_i32 dim 1 : vector<1x512xf32>, i32 -> vector<1x512xf32>
    %93 = arith.mulf %92, %51 : vector<1x512xf32>
    %c0_51 = arith.constant 0 : index
    %c0_52 = arith.constant 0 : index
    %94 = vector.load %arg8[%c0_51, %c0_52] : memref<128x512xf32, #tpu.memory_space<vmem>>, vector<1x512xf32>
    tpu.vector_store %arg8[%c0_51, %c0_52], %93 {strides = array<i32>} : memref<128x512xf32, #tpu.memory_space<vmem>>, vector<1x512xf32>,
    %c16_i32 = arith.constant 16 : i32
    %95 = tpu.dynamic_rotate %91 by %c16_i32 dim 1 : vector<1x512xf32>, i32 -> vector<1x512xf32>
    %96 = arith.mulf %95, %55 : vector<1x512xf32>
    %c1_53 = arith.constant 1 : index
    %c0_54 = arith.constant 0 : index
    %97 = vector.load %arg8[%c1_53, %c0_54] : memref<128x512xf32, #tpu.memory_space<vmem>>, vector<1x512xf32>
    tpu.vector_store %arg8[%c1_53, %c0_54], %96 {strides = array<i32>} : memref<128x512xf32, #tpu.memory_space<vmem>>, vector<1x512xf32>,
    %c15_i32 = arith.constant 15 : i32
    %98 = tpu.dynamic_rotate %91 by %c15_i32 dim 1 : vector<1x512xf32>, i32 -> vector<1x512xf32>
    %99 = arith.mulf %98, %62 : vector<1x512xf32>
    %c2_55 = arith.constant 2 : index
    %c0_56 = arith.constant 0 : index
    %100 = vector.load %arg8[%c2_55, %c0_56] : memref<128x512xf32, #tpu.memory_space<vmem>>, vector<1x512xf32>
    tpu.vector_store %arg8[%c2_55, %c0_56], %99 {strides = array<i32>} : memref<128x512xf32, #tpu.memory_space<vmem>>, vector<1x512xf32>,
    %c1_i32 = arith.constant 1 : i32
    %101 = tpu.dynamic_rotate %91 by %c1_i32 dim 1 : vector<1x512xf32>, i32 -> vector<1x512xf32>
    %102 = arith.mulf %101, %66 : vector<1x512xf32>
    %c3_57 = arith.constant 3 : index
    %c0_58 = arith.constant 0 : index
    %103 = vector.load %arg8[%c3_57, %c0_58] : memref<128x512xf32, #tpu.memory_space<vmem>>, vector<1x512xf32>
    tpu.vector_store %arg8[%c3_57, %c0_58], %102 {strides = array<i32>} : memref<128x512xf32, #tpu.memory_space<vmem>>, vector<1x512xf32>,
    %c4 = arith.constant 4 : index
    %c0_59 = arith.constant 0 : index
    %104 = vector.load %arg8[%c4, %c0_59] : memref<128x512xf32, #tpu.memory_space<vmem>>, vector<1x512xf32>
    tpu.vector_store %arg8[%c4, %c0_59], %91 {strides = array<i32>} : memref<128x512xf32, #tpu.memory_space<vmem>>, vector<1x512xf32>,
    %c511_i32 = arith.constant 511 : i32
    %105 = tpu.dynamic_rotate %91 by %c511_i32 dim 1 : vector<1x512xf32>, i32 -> vector<1x512xf32>
    %106 = arith.mulf %105, %70 : vector<1x512xf32>
    %c5 = arith.constant 5 : index
    %c0_60 = arith.constant 0 : index
    %107 = vector.load %arg8[%c5, %c0_60] : memref<128x512xf32, #tpu.memory_space<vmem>>, vector<1x512xf32>
    tpu.vector_store %arg8[%c5, %c0_60], %106 {strides = array<i32>} : memref<128x512xf32, #tpu.memory_space<vmem>>, vector<1x512xf32>,
    %c497_i32 = arith.constant 497 : i32
    %108 = tpu.dynamic_rotate %91 by %c497_i32 dim 1 : vector<1x512xf32>, i32 -> vector<1x512xf32>
    %109 = arith.mulf %108, %77 : vector<1x512xf32>
    %c6 = arith.constant 6 : index
    %c0_61 = arith.constant 0 : index
    %110 = vector.load %arg8[%c6, %c0_61] : memref<128x512xf32, #tpu.memory_space<vmem>>, vector<1x512xf32>
    tpu.vector_store %arg8[%c6, %c0_61], %109 {strides = array<i32>} : memref<128x512xf32, #tpu.memory_space<vmem>>, vector<1x512xf32>,
    %c496_i32 = arith.constant 496 : i32
    %111 = tpu.dynamic_rotate %91 by %c496_i32 dim 1 : vector<1x512xf32>, i32 -> vector<1x512xf32>
    %112 = arith.mulf %111, %81 : vector<1x512xf32>
    %c7 = arith.constant 7 : index
    %c0_62 = arith.constant 0 : index
    %113 = vector.load %arg8[%c7, %c0_62] : memref<128x512xf32, #tpu.memory_space<vmem>>, vector<1x512xf32>
    tpu.vector_store %arg8[%c7, %c0_62], %112 {strides = array<i32>} : memref<128x512xf32, #tpu.memory_space<vmem>>, vector<1x512xf32>,
    %c495_i32 = arith.constant 495 : i32
    %114 = tpu.dynamic_rotate %91 by %c495_i32 dim 1 : vector<1x512xf32>, i32 -> vector<1x512xf32>
    %115 = arith.mulf %114, %88 : vector<1x512xf32>
    %c8_63 = arith.constant 8 : index
    %c0_64 = arith.constant 0 : index
    %116 = vector.load %arg8[%c8_63, %c0_64] : memref<128x512xf32, #tpu.memory_space<vmem>>, vector<1x512xf32>
    tpu.vector_store %arg8[%c8_63, %c0_64], %115 {strides = array<i32>} : memref<128x512xf32, #tpu.memory_space<vmem>>, vector<1x512xf32>,
    %c0_65 = arith.constant 0 : index
    %c0_66 = arith.constant 0 : index
    %117 = vector.load %arg7[%c0_65, %c0_66] : memref<24x128xf32, #tpu.memory_space<vmem>>, vector<4x128xf32>
    %c0_67 = arith.constant 0 : index
    %c0_68 = arith.constant 0 : index
    %118 = vector.load %arg8[%c0_67, %c0_68] : memref<128x512xf32, #tpu.memory_space<vmem>>, vector<128x512xf32>
    %cst_69 = arith.constant dense<0.000000e+00> : vector<4x512xf32>
    %119 = tpu.matmul %117, %118, %cst_69 {dimension_numbers = #tpu.dot_dimension_numbers<[1], [0], [0], [1], [0, 0, 1, 1], [], []>} : vector<4x128xf32>, vector<128x512xf32>, vector<4x512xf32> -> vector<4x512xf32>
    %c0_70 = arith.constant 0 : index
    %c0_71 = arith.constant 0 : index
    %120 = vector.load %arg5[%c0_70, %c0_71] : memref<24x1xf32, #tpu.memory_space<vmem>>, vector<4x1xf32>
    %c4_72 = arith.constant 4 : index
    %c0_73 = arith.constant 0 : index
    %121 = vector.load %arg5[%c4_72, %c0_73] : memref<24x1xf32, #tpu.memory_space<vmem>>, vector<4x1xf32>
    %cst_74 = arith.constant dense<0.000000e+00> : vector<4xf32>
    %122 = vector.multi_reduction <add>, %119, %cst_74 [1] : vector<4x512xf32> to vector<4xf32>
    %123 = vector.shape_cast %122 : vector<4xf32> to vector<4x1xf32>
    %cst_75 = arith.constant 0.001953125 : f32
    %124 = vector.broadcast %cst_75 : f32 to vector<4x1xf32>
    %125 = arith.mulf %123, %124 : vector<4x1xf32>
    %126 = arith.mulf %119, %119 : vector<4x512xf32>
    %cst_76 = arith.constant dense<0.000000e+00> : vector<4xf32>
    %127 = vector.multi_reduction <add>, %126, %cst_76 [1] : vector<4x512xf32> to vector<4xf32>
    %128 = vector.shape_cast %127 : vector<4xf32> to vector<4x1xf32>
    %cst_77 = arith.constant 0.001953125 : f32
    %129 = vector.broadcast %cst_77 : f32 to vector<4x1xf32>
    %130 = arith.mulf %128, %129 : vector<4x1xf32>
    %131 = arith.mulf %125, %125 : vector<4x1xf32>
    %132 = arith.subf %130, %131 : vector<4x1xf32>
    %cst_78 = arith.constant 0.000000e+00 : f32
    %133 = vector.broadcast %cst_78 : f32 to vector<4x1xf32>
    %134 = arith.maximumf %132, %133 : vector<4x1xf32>
    %cst_79 = arith.constant 9.99999974E-6 : f32
    %135 = vector.broadcast %cst_79 : f32 to vector<4x1xf32>
    %136 = arith.addf %134, %135 : vector<4x1xf32>
    %137 = math.rsqrt %136 : vector<4x1xf32>
    %138 = arith.mulf %120, %137 : vector<4x1xf32>
    %139 = arith.mulf %125, %138 : vector<4x1xf32>
    %140 = arith.subf %121, %139 : vector<4x1xf32>
    %141 = vector.broadcast %138 : vector<4x1xf32> to vector<4x512xf32>
    %142 = arith.mulf %119, %141 : vector<4x512xf32>
    %143 = vector.broadcast %140 : vector<4x1xf32> to vector<4x512xf32>
    %144 = arith.addf %142, %143 : vector<4x512xf32>
    %cst_80 = arith.constant 0.000000e+00 : f32
    %145 = vector.broadcast %cst_80 : f32 to vector<4x512xf32>
    %146 = arith.maximumf %144, %145 : vector<4x512xf32>
    %c17_i32_81 = arith.constant 17 : i32
    %147 = tpu.dynamic_rotate %146 by %c17_i32_81 dim 1 : vector<4x512xf32>, i32 -> vector<4x512xf32>
    %148 = vector.broadcast %51 : vector<1x512xf32> to vector<4x512xf32>
    %149 = arith.mulf %147, %148 : vector<4x512xf32>
    %c0_82 = arith.constant 0 : index
    %c0_83 = arith.constant 0 : index
    %150 = vector.load %arg8[%c0_82, %c0_83] : memref<128x512xf32, #tpu.memory_space<vmem>>, vector<4x512xf32>
    tpu.vector_store %arg8[%c0_82, %c0_83], %149 {strides = array<i32>} : memref<128x512xf32, #tpu.memory_space<vmem>>, vector<4x512xf32>,
    %c16_i32_84 = arith.constant 16 : i32
    %151 = tpu.dynamic_rotate %146 by %c16_i32_84 dim 1 : vector<4x512xf32>, i32 -> vector<4x512xf32>
    %152 = vector.broadcast %55 : vector<1x512xf32> to vector<4x512xf32>
    %153 = arith.mulf %151, %152 : vector<4x512xf32>
    %c4_85 = arith.constant 4 : index
    %c0_86 = arith.constant 0 : index
    %154 = vector.load %arg8[%c4_85, %c0_86] : memref<128x512xf32, #tpu.memory_space<vmem>>, vector<4x512xf32>
    tpu.vector_store %arg8[%c4_85, %c0_86], %153 {strides = array<i32>} : memref<128x512xf32, #tpu.memory_space<vmem>>, vector<4x512xf32>,
    %c15_i32_87 = arith.constant 15 : i32
    %155 = tpu.dynamic_rotate %146 by %c15_i32_87 dim 1 : vector<4x512xf32>, i32 -> vector<4x512xf32>
    %156 = vector.broadcast %62 : vector<1x512xf32> to vector<4x512xf32>
    %157 = arith.mulf %155, %156 : vector<4x512xf32>
    %c8_88 = arith.constant 8 : index
    %c0_89 = arith.constant 0 : index
    %158 = vector.load %arg8[%c8_88, %c0_89] : memref<128x512xf32, #tpu.memory_space<vmem>>, vector<4x512xf32>
    tpu.vector_store %arg8[%c8_88, %c0_89], %157 {strides = array<i32>} : memref<128x512xf32, #tpu.memory_space<vmem>>, vector<4x512xf32>,
    %c1_i32_90 = arith.constant 1 : i32
    %159 = tpu.dynamic_rotate %146 by %c1_i32_90 dim 1 : vector<4x512xf32>, i32 -> vector<4x512xf32>
    %160 = vector.broadcast %66 : vector<1x512xf32> to vector<4x512xf32>
    %161 = arith.mulf %159, %160 : vector<4x512xf32>
    %c12_91 = arith.constant 12 : index
    %c0_92 = arith.constant 0 : index
    %162 = vector.load %arg8[%c12_91, %c0_92] : memref<128x512xf32, #tpu.memory_space<vmem>>, vector<4x512xf32>
    tpu.vector_store %arg8[%c12_91, %c0_92], %161 {strides = array<i32>} : memref<128x512xf32, #tpu.memory_space<vmem>>, vector<4x512xf32>,
    %c16_93 = arith.constant 16 : index
    %c0_94 = arith.constant 0 : index
    %163 = vector.load %arg8[%c16_93, %c0_94] : memref<128x512xf32, #tpu.memory_space<vmem>>, vector<4x512xf32>
    tpu.vector_store %arg8[%c16_93, %c0_94], %146 {strides = array<i32>} : memref<128x512xf32, #tpu.memory_space<vmem>>, vector<4x512xf32>,
    %c511_i32_95 = arith.constant 511 : i32
    %164 = tpu.dynamic_rotate %146 by %c511_i32_95 dim 1 : vector<4x512xf32>, i32 -> vector<4x512xf32>
    %165 = vector.broadcast %70 : vector<1x512xf32> to vector<4x512xf32>
    %166 = arith.mulf %164, %165 : vector<4x512xf32>
    %c20 = arith.constant 20 : index
    %c0_96 = arith.constant 0 : index
    %167 = vector.load %arg8[%c20, %c0_96] : memref<128x512xf32, #tpu.memory_space<vmem>>, vector<4x512xf32>
    tpu.vector_store %arg8[%c20, %c0_96], %166 {strides = array<i32>} : memref<128x512xf32, #tpu.memory_space<vmem>>, vector<4x512xf32>,
    %c497_i32_97 = arith.constant 497 : i32
    %168 = tpu.dynamic_rotate %146 by %c497_i32_97 dim 1 : vector<4x512xf32>, i32 -> vector<4x512xf32>
    %169 = vector.broadcast %77 : vector<1x512xf32> to vector<4x512xf32>
    %170 = arith.mulf %168, %169 : vector<4x512xf32>
    %c24 = arith.constant 24 : index
    %c0_98 = arith.constant 0 : index
    %171 = vector.load %arg8[%c24, %c0_98] : memref<128x512xf32, #tpu.memory_space<vmem>>, vector<4x512xf32>
    tpu.vector_store %arg8[%c24, %c0_98], %170 {strides = array<i32>} : memref<128x512xf32, #tpu.memory_space<vmem>>, vector<4x512xf32>,
    %c496_i32_99 = arith.constant 496 : i32
    %172 = tpu.dynamic_rotate %146 by %c496_i32_99 dim 1 : vector<4x512xf32>, i32 -> vector<4x512xf32>
    %173 = vector.broadcast %81 : vector<1x512xf32> to vector<4x512xf32>
    %174 = arith.mulf %172, %173 : vector<4x512xf32>
    %c28 = arith.constant 28 : index
    %c0_100 = arith.constant 0 : index
    %175 = vector.load %arg8[%c28, %c0_100] : memref<128x512xf32, #tpu.memory_space<vmem>>, vector<4x512xf32>
    tpu.vector_store %arg8[%c28, %c0_100], %174 {strides = array<i32>} : memref<128x512xf32, #tpu.memory_space<vmem>>, vector<4x512xf32>,
    %c495_i32_101 = arith.constant 495 : i32
    %176 = tpu.dynamic_rotate %146 by %c495_i32_101 dim 1 : vector<4x512xf32>, i32 -> vector<4x512xf32>
    %177 = vector.broadcast %88 : vector<1x512xf32> to vector<4x512xf32>
    %178 = arith.mulf %176, %177 : vector<4x512xf32>
    %c32_102 = arith.constant 32 : index
    %c0_103 = arith.constant 0 : index
    %179 = vector.load %arg8[%c32_102, %c0_103] : memref<128x512xf32, #tpu.memory_space<vmem>>, vector<4x512xf32>
    tpu.vector_store %arg8[%c32_102, %c0_103], %178 {strides = array<i32>} : memref<128x512xf32, #tpu.memory_space<vmem>>, vector<4x512xf32>,
    %c8_104 = arith.constant 8 : index
    %c0_105 = arith.constant 0 : index
    %180 = vector.load %arg7[%c8_104, %c0_105] : memref<24x128xf32, #tpu.memory_space<vmem>>, vector<8x128xf32>
    %c0_106 = arith.constant 0 : index
    %c0_107 = arith.constant 0 : index
    %181 = vector.load %arg8[%c0_106, %c0_107] : memref<128x512xf32, #tpu.memory_space<vmem>>, vector<128x512xf32>
    %cst_108 = arith.constant dense<0.000000e+00> : vector<8x512xf32>
    %182 = tpu.matmul %180, %181, %cst_108 {dimension_numbers = #tpu.dot_dimension_numbers<[1], [0], [0], [1], [0, 0, 1, 1], [], []>} : vector<8x128xf32>, vector<128x512xf32>, vector<8x512xf32> -> vector<8x512xf32>
    %c8_109 = arith.constant 8 : index
    %c0_110 = arith.constant 0 : index
    %183 = vector.load %arg5[%c8_109, %c0_110] : memref<24x1xf32, #tpu.memory_space<vmem>>, vector<8x1xf32>
    %c16_111 = arith.constant 16 : index
    %c0_112 = arith.constant 0 : index
    %184 = vector.load %arg5[%c16_111, %c0_112] : memref<24x1xf32, #tpu.memory_space<vmem>>, vector<8x1xf32>
    %cst_113 = arith.constant dense<0.000000e+00> : vector<8xf32>
    %185 = vector.multi_reduction <add>, %182, %cst_113 [1] : vector<8x512xf32> to vector<8xf32>
    %186 = vector.shape_cast %185 : vector<8xf32> to vector<8x1xf32>
    %cst_114 = arith.constant 0.001953125 : f32
    %187 = vector.broadcast %cst_114 : f32 to vector<8x1xf32>
    %188 = arith.mulf %186, %187 : vector<8x1xf32>
    %189 = arith.mulf %182, %182 : vector<8x512xf32>
    %cst_115 = arith.constant dense<0.000000e+00> : vector<8xf32>
    %190 = vector.multi_reduction <add>, %189, %cst_115 [1] : vector<8x512xf32> to vector<8xf32>
    %191 = vector.shape_cast %190 : vector<8xf32> to vector<8x1xf32>
    %cst_116 = arith.constant 0.001953125 : f32
    %192 = vector.broadcast %cst_116 : f32 to vector<8x1xf32>
    %193 = arith.mulf %191, %192 : vector<8x1xf32>
    %194 = arith.mulf %188, %188 : vector<8x1xf32>
    %195 = arith.subf %193, %194 : vector<8x1xf32>
    %cst_117 = arith.constant 0.000000e+00 : f32
    %196 = vector.broadcast %cst_117 : f32 to vector<8x1xf32>
    %197 = arith.maximumf %195, %196 : vector<8x1xf32>
    %cst_118 = arith.constant 9.99999974E-6 : f32
    %198 = vector.broadcast %cst_118 : f32 to vector<8x1xf32>
    %199 = arith.addf %197, %198 : vector<8x1xf32>
    %200 = math.rsqrt %199 : vector<8x1xf32>
    %201 = arith.mulf %183, %200 : vector<8x1xf32>
    %202 = arith.mulf %188, %201 : vector<8x1xf32>
    %203 = arith.subf %184, %202 : vector<8x1xf32>
    %204 = vector.broadcast %201 : vector<8x1xf32> to vector<8x512xf32>
    %205 = arith.mulf %182, %204 : vector<8x512xf32>
    %206 = vector.broadcast %203 : vector<8x1xf32> to vector<8x512xf32>
    %207 = arith.addf %205, %206 : vector<8x512xf32>
    %cst_119 = arith.constant 0.000000e+00 : f32
    %208 = vector.broadcast %cst_119 : f32 to vector<8x512xf32>
    %209 = arith.maximumf %207, %208 : vector<8x512xf32>
    %c17_i32_120 = arith.constant 17 : i32
    %210 = tpu.dynamic_rotate %209 by %c17_i32_120 dim 1 : vector<8x512xf32>, i32 -> vector<8x512xf32>
    %211 = vector.broadcast %51 : vector<1x512xf32> to vector<8x512xf32>
    %212 = arith.mulf %210, %211 : vector<8x512xf32>
    %c0_121 = arith.constant 0 : index
    %c0_122 = arith.constant 0 : index
    %213 = vector.load %arg8[%c0_121, %c0_122] : memref<128x512xf32, #tpu.memory_space<vmem>>, vector<8x512xf32>
    tpu.vector_store %arg8[%c0_121, %c0_122], %212 {strides = array<i32>} : memref<128x512xf32, #tpu.memory_space<vmem>>, vector<8x512xf32>,
    %c16_i32_123 = arith.constant 16 : i32
    %214 = tpu.dynamic_rotate %209 by %c16_i32_123 dim 1 : vector<8x512xf32>, i32 -> vector<8x512xf32>
    %215 = vector.broadcast %55 : vector<1x512xf32> to vector<8x512xf32>
    %216 = arith.mulf %214, %215 : vector<8x512xf32>
    %c8_124 = arith.constant 8 : index
    %c0_125 = arith.constant 0 : index
    %217 = vector.load %arg8[%c8_124, %c0_125] : memref<128x512xf32, #tpu.memory_space<vmem>>, vector<8x512xf32>
    tpu.vector_store %arg8[%c8_124, %c0_125], %216 {strides = array<i32>} : memref<128x512xf32, #tpu.memory_space<vmem>>, vector<8x512xf32>,
    %c15_i32_126 = arith.constant 15 : i32
    %218 = tpu.dynamic_rotate %209 by %c15_i32_126 dim 1 : vector<8x512xf32>, i32 -> vector<8x512xf32>
    %219 = vector.broadcast %62 : vector<1x512xf32> to vector<8x512xf32>
    %220 = arith.mulf %218, %219 : vector<8x512xf32>
    %c16_127 = arith.constant 16 : index
    %c0_128 = arith.constant 0 : index
    %221 = vector.load %arg8[%c16_127, %c0_128] : memref<128x512xf32, #tpu.memory_space<vmem>>, vector<8x512xf32>
    tpu.vector_store %arg8[%c16_127, %c0_128], %220 {strides = array<i32>} : memref<128x512xf32, #tpu.memory_space<vmem>>, vector<8x512xf32>,
    %c1_i32_129 = arith.constant 1 : i32
    %222 = tpu.dynamic_rotate %209 by %c1_i32_129 dim 1 : vector<8x512xf32>, i32 -> vector<8x512xf32>
    %223 = vector.broadcast %66 : vector<1x512xf32> to vector<8x512xf32>
    %224 = arith.mulf %222, %223 : vector<8x512xf32>
    %c24_130 = arith.constant 24 : index
    %c0_131 = arith.constant 0 : index
    %225 = vector.load %arg8[%c24_130, %c0_131] : memref<128x512xf32, #tpu.memory_space<vmem>>, vector<8x512xf32>
    tpu.vector_store %arg8[%c24_130, %c0_131], %224 {strides = array<i32>} : memref<128x512xf32, #tpu.memory_space<vmem>>, vector<8x512xf32>,
    %c32_132 = arith.constant 32 : index
    %c0_133 = arith.constant 0 : index
    %226 = vector.load %arg8[%c32_132, %c0_133] : memref<128x512xf32, #tpu.memory_space<vmem>>, vector<8x512xf32>
    tpu.vector_store %arg8[%c32_132, %c0_133], %209 {strides = array<i32>} : memref<128x512xf32, #tpu.memory_space<vmem>>, vector<8x512xf32>,
    %c511_i32_134 = arith.constant 511 : i32
    %227 = tpu.dynamic_rotate %209 by %c511_i32_134 dim 1 : vector<8x512xf32>, i32 -> vector<8x512xf32>
    %228 = vector.broadcast %70 : vector<1x512xf32> to vector<8x512xf32>
    %229 = arith.mulf %227, %228 : vector<8x512xf32>
    %c40 = arith.constant 40 : index
    %c0_135 = arith.constant 0 : index
    %230 = vector.load %arg8[%c40, %c0_135] : memref<128x512xf32, #tpu.memory_space<vmem>>, vector<8x512xf32>
    tpu.vector_store %arg8[%c40, %c0_135], %229 {strides = array<i32>} : memref<128x512xf32, #tpu.memory_space<vmem>>, vector<8x512xf32>,
    %c497_i32_136 = arith.constant 497 : i32
    %231 = tpu.dynamic_rotate %209 by %c497_i32_136 dim 1 : vector<8x512xf32>, i32 -> vector<8x512xf32>
    %232 = vector.broadcast %77 : vector<1x512xf32> to vector<8x512xf32>
    %233 = arith.mulf %231, %232 : vector<8x512xf32>
    %c48 = arith.constant 48 : index
    %c0_137 = arith.constant 0 : index
    %234 = vector.load %arg8[%c48, %c0_137] : memref<128x512xf32, #tpu.memory_space<vmem>>, vector<8x512xf32>
    tpu.vector_store %arg8[%c48, %c0_137], %233 {strides = array<i32>} : memref<128x512xf32, #tpu.memory_space<vmem>>, vector<8x512xf32>,
    %c496_i32_138 = arith.constant 496 : i32
    %235 = tpu.dynamic_rotate %209 by %c496_i32_138 dim 1 : vector<8x512xf32>, i32 -> vector<8x512xf32>
    %236 = vector.broadcast %81 : vector<1x512xf32> to vector<8x512xf32>
    %237 = arith.mulf %235, %236 : vector<8x512xf32>
    %c56 = arith.constant 56 : index
    %c0_139 = arith.constant 0 : index
    %238 = vector.load %arg8[%c56, %c0_139] : memref<128x512xf32, #tpu.memory_space<vmem>>, vector<8x512xf32>
    tpu.vector_store %arg8[%c56, %c0_139], %237 {strides = array<i32>} : memref<128x512xf32, #tpu.memory_space<vmem>>, vector<8x512xf32>,
    %c495_i32_140 = arith.constant 495 : i32
    %239 = tpu.dynamic_rotate %209 by %c495_i32_140 dim 1 : vector<8x512xf32>, i32 -> vector<8x512xf32>
    %240 = vector.broadcast %88 : vector<1x512xf32> to vector<8x512xf32>
    %241 = arith.mulf %239, %240 : vector<8x512xf32>
    %c64 = arith.constant 64 : index
    %c0_141 = arith.constant 0 : index
    %242 = vector.load %arg8[%c64, %c0_141] : memref<128x512xf32, #tpu.memory_space<vmem>>, vector<8x512xf32>
    tpu.vector_store %arg8[%c64, %c0_141], %241 {strides = array<i32>} : memref<128x512xf32, #tpu.memory_space<vmem>>, vector<8x512xf32>,
    %c16_142 = arith.constant 16 : index
    %c0_143 = arith.constant 0 : index
    %243 = vector.load %arg7[%c16_142, %c0_143] : memref<24x128xf32, #tpu.memory_space<vmem>>, vector<1x128xf32>
    %c0_144 = arith.constant 0 : index
    %c0_145 = arith.constant 0 : index
    %244 = vector.load %arg8[%c0_144, %c0_145] : memref<128x512xf32, #tpu.memory_space<vmem>>, vector<128x512xf32>
    %cst_146 = arith.constant dense<0.000000e+00> : vector<1x512xf32>
    %245 = tpu.matmul %243, %244, %cst_146 {dimension_numbers = #tpu.dot_dimension_numbers<[1], [0], [0], [1], [0, 0, 1, 1], [], []>} : vector<1x128xf32>, vector<128x512xf32>, vector<1x512xf32> -> vector<1x512xf32>
    %246 = math.tanh %245 : vector<1x512xf32>
    %c0_147 = arith.constant 0 : index
    %c0_148 = arith.constant 0 : index
    %247 = vector.load %arg6[%c0_147, %c0_148] : memref<1x512xf32, #tpu.memory_space<vmem>>, vector<1x512xf32>
    tpu.vector_store %arg6[%c0_147, %c0_148], %246 {strides = array<i32>} : memref<1x512xf32, #tpu.memory_space<vmem>>, vector<1x512xf32>,
    return
  }
}

</mosaic_0001>

<bundles_post_ra>
// kernel: tpu_custom_call.1
= control target key start
LH: loop header
LB: loop body
LE: loop exit
PB: predicated region body
PF: predicated region fallthrough
CT: control target
= control target key end

     0   :  { %11 = vsyncpa [#allocation5], 0  ;;  %s4088_s0 = inlined_call_operand.hbm [shape: f32[1,8], index: 0, kind: input, shape index: {}]   ;;  %s4089_s1 = inlined_call_operand.hbm [shape: f32[9,16], index: 1, kind: input, shape index: {}]   ;;  %s4090_s2 = inlined_call_operand.vmem [shape: f32[17,32], index: 2, kind: input, shape index: {}]   ;;  %s4091_s3 = inlined_call_operand.hbm [shape: f32[33,1664], index: 3, kind: input, shape index: {}]   ;;  %s4092_s4 = inlined_call_operand.vmem [shape: f32[3,512], index: 4, kind: input, shape index: {}]   ;;  %s4093_s5 = inlined_call_operand.vmem [shape: f32[24,1], index: 5, kind: input, shape index: {}]   ;;  %s4094_s6 = inlined_call_operand.hbm [shape: f32[1,512], index: 6, kind: output, shape index: {}]  }
   0x1   :  { %12 = vsyncpa [#allocation8], 0 }
   0x2   :  { %13 = vsyncpa [#allocation6], 0  ;;  %s3125_s21 = smov [#allocation7]   ;;  %s3031_s25 = scalar_lea.hbm %s4089_s1, 256 }
   0x3   :  { %s29_s22 = sshll.u32 %s3125_s21, 4  ;;  %p3032_p0 = scmp.ne.s32.totalorder %s4089_s1, %s3031_s25  ;;  %s30_s22 = int_to_ptr.vmem [resolvable:$true] %s29_s22 }
   0x4   :  { %p3035_p1 = scmp.lt.u32.totalorder %s3031_s25, %s4089_s1 }
   0x6   :  { %p3037_p2 = pnand %p3035_p1, %p3032_p0 }
   0x8   :  { %3040 = shalt.err (!%p3037_p2)
}
   0x9   :  { %s3041_s30 = scalar_lea.vmem %s30_s22, 256  ;;  %p3046_p4 = scmp.lt.s32.totalorder %s30_s22, %s30_s22 }
   0xa   :  { %p3042_p3 = scmp.ne.s32.totalorder %s30_s22, %s3041_s30  ;;  %p3047_p5 = scmp.lt.s32.totalorder %s3041_s30, %s3041_s30 }
   0xc   :  { %p3048_p6 = por %p3047_p5, %p3046_p4 }
   0xe   :  { %p3049_p7 = pnand %p3048_p6, %p3042_p3 }
  0x10   :  { %3052 = shalt.err (!%p3049_p7)
}
  0x11   :  { %s3126_s7 = smov 128   ;;  %s3127_s8 = smov 8  }
  0x12   :  { %35 = dma.hbm_to_vmem [thread:$0]  %s4089_s1, 256, %s30_s22, [#allocation8], %s3126_s7, %s3126_s7, %s3127_s8  }
  0x13   :  { %s3128_s11 = smov [#allocation4]   ;;  %s3129_s13 = smov [#allocation9]  }
  0x14   :  { %s20_s12 = sshll.u32 %s3128_s11, 4  ;;  %s43_s14 = sshll.u32 %s3129_s13, 4  ;;  %s21_s12 = int_to_ptr.vmem [resolvable:$true] %s20_s12  ;;  %s44_s14 = int_to_ptr.vmem [resolvable:$true] %s43_s14 }
  0x15   :  { %s3053_s17 = scalar_lea.hbm %s4088_s0, 16 }
  0x16   :  { %p3054_p8 = scmp.ne.s32.totalorder %s4088_s0, %s3053_s17  ;;  %p3057_p9 = scmp.lt.u32.totalorder %s3053_s17, %s4088_s0 }
  0x18   :  { %p3059_p10 = pnand %p3057_p9, %p3054_p8 }
  0x1a   :  { %3062 = shalt.err (!%p3059_p10)
}
  0x1b   :  { %s3063_s1 = scalar_lea.vmem %s21_s12, 16  ;;  %s3067_s22 = scalar_lea.vmem %s21_s12, 32 }
  0x1c   :  { %p3064_p11 = scmp.ne.s32.totalorder %s21_s12, %s3063_s1  ;;  %p3068_p12 = scmp.lt.s32.totalorder %s21_s12, %s21_s12 }
  0x1d   :  { %p3069_p13 = scmp.lt.s32.totalorder %s3067_s22, %s3063_s1 }
  0x1f   :  { %p3070_p0 = por %p3069_p13, %p3068_p12 }
  0x21   :  { %p3071_p1 = pnand %p3070_p0, %p3064_p11 }
  0x23   :  { %3074 = shalt.err (!%p3071_p1)
}
  0x24   :  { %23 = dma.hbm_to_vmem [thread:$0]  %s4088_s0, 16, %s21_s12, [#allocation5]  }
  0x25   :  { %s3075_s27 = scalar_lea.hbm %s4091_s3, 8320 }
  0x26   :  { %p3076_p2 = scmp.ne.s32.totalorder %s4091_s3, %s3075_s27  ;;  %p3079_p3 = scmp.lt.u32.totalorder %s3075_s27, %s4091_s3 }
  0x28   :  { %p3081_p4 = pnand %p3079_p3, %p3076_p2 }
  0x2a   :  { %3084 = shalt.err (!%p3081_p4)
}
  0x2b   :  { %s3085_s8 = scalar_lea.vmem %s44_s14, 8320  ;;  %p3090_p6 = scmp.lt.s32.totalorder %s44_s14, %s44_s14 }
  0x2c   :  { %p3086_p5 = scmp.ne.s32.totalorder %s44_s14, %s3085_s8  ;;  %p3091_p7 = scmp.lt.s32.totalorder %s3085_s8, %s3085_s8 }
  0x2e   :  { %p3092_p8 = por %p3091_p7, %p3090_p6 }
  0x30   :  { %p3093_p9 = pnand %p3092_p8, %p3086_p5 }
  0x32   :  { %3096 = shalt.err (!%p3093_p9)
}
  0x33   :  { %s3130_s0 = smov 1664   ;;  %s3131_s9 = smov 104  }
  0x34   :  { %49 = dma.hbm_to_vmem [thread:$0]  %s4091_s3, 8320, %s44_s14, [#allocation8], %s3130_s0, %s3130_s0, %s3131_s9  }
  0x35   :  { %3119 = dma.done.wait [#allocation5], 16  }
  0x36   :  { %3120 = vsyncadd [#allocation5], 4294967280 }
  0x37   :  { %3121 = dma.done.wait [#allocation8], 8576  }
  0x38   :  { %3122 = vsyncadd [#allocation8], 4294958720  ;;  %v4097_v0 = vmov 0.0   ;;  %vm3133_vm0 = vmmov 0   ;;  %vm66_vm1 = vcmask 64512   ;;  %v64_v1 = vld [vmem:[#allocation7] sm:$0xff]  ;;  %v281_v7 = vlaneseq }
  0x39   :  { %2722 = vmatprep.subr.mxu1 %v4097_v0  ;;  %887 = vst [vmem:[#allocation3] sm:$0xff] %v4097_v0  ;;  %888 = vst [vmem:[#allocation3 + $0x8] sm:$0xff] %v4097_v0  ;;  %2724 = vmatprep.mubr.msk.f32.mxu1 %vm3133_vm0, %v4097_v0  ;;  %v63_v2 = vld [vmem:[#allocation4] sm:$0x1]  ;;  %v141_v3 = vld [vmem:[%s4090_s2] sm:$0xff]  ;;  %v4095_v6 = vmov 0.0|0.0  }
  0x3a   :  { %889 = vst [vmem:[#allocation3 + $0x10] sm:$0xff] %v4097_v0  ;;  %890 = vst [vmem:[#allocation3 + $0x18] sm:$0xff] %v4097_v0  ;;  %414 = vmatprep.mubr.f32.mxu0 %v4097_v0  ;;  %2723 = vmatpush3.msra.mxu1 %v64_v1  ;;  %v142_v4 = vld [vmem:[%s4090_s2 + $0x8] sm:$0xff]  ;;  %v220_v8 = vld [vmem:[#allocation9 + $0x8] sm:$0xff]  ;;  %v3252_v11 = vshrl.u32 %v281_v7, 7  ;;  %s3135_s17 = smov 17  }
  0x3b   :  { %891 = vst [vmem:[#allocation3 + $0x20] sm:$0xff] %v4097_v0  ;;  %892 = vst [vmem:[#allocation3 + $0x28] sm:$0xff] %v4097_v0  ;;  %2725 = vmatmul.mubr.msk.f32.vlgmr.msra.gmra.mrb[0].mxu1 %vm66_vm1, %v63_v2  ;;  %v2746_v5 = vpack.c.bf16 %v142_v4, %v141_v3  ;;  %2745 = vmatprep.subr.bf16.mxu1 %v4095_v6  ;;  %v233_v9 = vld [vmem:[#allocation9 + $0x70] sm:$0xff]  ;;  %v222_v10 = vld [vmem:[#allocation9 + $0x18] sm:$0xff]  ;;  %s3136_s18 = smov 16   ;;  %s3137_s19 = smov 15  }
  0x3c   :  { %893 = vst [vmem:[#allocation3 + $0x30] sm:$0xff] %v4097_v0  ;;  %894 = vst [vmem:[#allocation3 + $0x38] sm:$0xff] %v4097_v0  ;;  %2731 = vmatprep.mubr.msk.f32.mxu1 %vm3133_vm0, %v4097_v0  ;;  %v2748_v12 = vpack.c.bf16 %v233_v9, %v220_v8  ;;  %v235_v13 = vld [vmem:[#allocation9 + $0x80] sm:$0xff]  ;;  %v232_v15 = vld [vmem:[#allocation9 + $0x68] sm:$0xff]  ;;  %v3260_v19 = vsub.s32 2, %v3252_v11  ;;  %v3263_v20 = vsub.s32 0, %v3252_v11 }
  0x3d   :  { %895 = vst [vmem:[#allocation3 + $0x40] sm:$0xff] %v4097_v0  ;;  %896 = vst [vmem:[#allocation3 + $0x48] sm:$0xff] %v4097_v0  ;;  %2747 = vmatpush3.bf16.msra.mxu1 %v2746_v5  ;;  %v219_v14 = vld [vmem:[#allocation9] sm:$0xff]  ;;  %v2756_v17 = vpack.c.bf16 %v235_v13, %v222_v10  ;;  %v3266_v21 = vsub.s32 3, %v3252_v11  ;;  %v3269_v22 = vsub.s32 1, %v3252_v11  ;;  %s3138_s20 = smov 1  }
  0x3e   :  { %897 = vst [vmem:[#allocation3 + $0x50] sm:$0xff] %v4097_v0  ;;  %898 = vst [vmem:[#allocation3 + $0x58] sm:$0xff] %v4097_v0  ;;  %v3257_v16 = vld [vmem:[%s4092_s4] ss:$4 sm:$0xf]  ;;  %v2750_v18 = vpack.c.bf16 %v232_v15, %v219_v14  ;;  %2749 = vmatprep.subr.bf16.mxu0 %v2748_v12  ;;  %s3139_s21 = smov 127  }
  0x3f   :  { %899 = vst [vmem:[#allocation3 + $0x60] sm:$0xff] %v4097_v0  ;;  %900 = vst [vmem:[#allocation3 + $0x68] sm:$0xff] %v4097_v0  ;;  %2757 = vmatprep.subr.bf16.mxu1 %v2756_v17  ;;  %v964_v23 = vrot.slane %v3257_v16, %v3260_v19  ;;  %v956_v24 = vrot.slane %v3257_v16, %v3263_v20  ;;  %v968_v25 = vrot.slane %v3257_v16, %v3266_v21  ;;  %s3140_s1 = smov 113   ;;  %s3141_s22 = smov 112   ;;  %v65_v27 = vld [vmem:[#allocation7 + $0x8] sm:$0x1] }
  0x40   :  { %901 = vst [vmem:[#allocation3 + $0x70] sm:$0xff] %v4097_v0  ;;  %902 = vst [vmem:[#allocation3 + $0x78] sm:$0xff] %v4097_v0  ;;  %2751 = vmatpush1.bf16.msra.mxu0 %v2750_v18  ;;  %v960_v26 = vrot.slane %v3257_v16, %v3269_v22  ;;  %s3142_s23 = smov 111   ;;  %v221_v28 = vld [vmem:[#allocation9 + $0x10] sm:$0xff]  ;;  %v234_v29 = vld [vmem:[#allocation9 + $0x78] sm:$0xff]  ;;  %vm144_vm2 = vcmask 130048  }
  0x41   :  { %903 = vst [vmem:[#allocation3 + $0x80] sm:$0xff] %v4097_v0  ;;  %904 = vst [vmem:[#allocation3 + $0x88] sm:$0xff] %v4097_v0  ;;  %977 = vrot.lane.b32.xlu1 %v964_v23, %s3135_s17  ;;  %973 = vrot.lane.b32.xlu0 %v956_v24, %s3135_s17  ;;  %v2758_v33 = vpack.c.bf16 %v234_v29, %v221_v28  ;;  %v246_v35 = vld [vmem:[#allocation9 + $0xd8] sm:$0xff]  ;;  %v259_v36 = vld [vmem:[#allocation9 + $0x140] sm:$0xff]  ;;  %v3143_v53 = vmov 1966171168  }
  0x42   :  { %905 = vst [vmem:[#allocation3 + $0x90] sm:$0xff] %v4097_v0  ;;  %906 = vst [vmem:[#allocation3 + $0x98] sm:$0xff] %v4097_v0  ;;  %v248_v37 = vld [vmem:[#allocation9 + $0xe8] sm:$0xff]  ;;  %v2752_v38 = vpack.c.bf16 %v259_v36, %v246_v35  ;;  %v261_v39 = vld [vmem:[#allocation9 + $0x150] sm:$0xff]  ;;  %v1020_v54 = vunpack.c.l.s4 %v3143_v53  ;;  %v3313_v57 = vand.u32 127, %v281_v7  ;;  %vm3321_vm3 = vcmp.lt.s32.totalorder %v281_v7, 512 }
  0x43   :  { %923 = vst [vmem:[#allocation3 + $0x120] sm:$0xff] %v4097_v0  ;;  %v245_v40 = vld [vmem:[#allocation9 + $0xd0] sm:$0xff]  ;;  %v258_v41 = vld [vmem:[#allocation9 + $0x138] sm:$0xff]  ;;  %v2760_v42 = vpack.c.bf16 %v261_v39, %v248_v37  ;;  %v247_v44 = vld [vmem:[#allocation9 + $0xe0] sm:$0xff]  ;;  %v4102_v59 = vmov 0 }
  0x44   :  { %v2754_v43 = vpack.c.bf16 %v258_v41, %v245_v40  ;;  %v260_v45 = vld [vmem:[#allocation9 + $0x148] sm:$0xff]  ;;  %2753 = vmatprep.subr.bf16.mxu0 %v2752_v38  ;;  %v237_v48 = vld [vmem:[#allocation9 + $0x90] sm:$0xff]  ;;  %v226_v49 = vld [vmem:[#allocation9 + $0x38] sm:$0xff]  ;;  %v4103_v59 = vsel %vm3321_vm3, 4294967295, %v4102_v59  ;;  %vm983_vm5 = vcmp.lt.s32.totalorder %v3313_v57, 17  ;;  %v1021_v61 = vunpack.c.0.s8 %v1020_v54 }
  0x45   :  { %979 = vrot.lane.b32.xlu1 %v968_v25, %s3135_s17  ;;  %975 = vrot.lane.b32.xlu0 %v960_v26, %s3135_s17  ;;  %v2762_v46 = vpack.c.bf16 %v260_v45, %v247_v44  ;;  %v224_v47 = vld [vmem:[#allocation9 + $0x28] sm:$0xff]  ;;  %v239_v51 = vld [vmem:[#allocation9 + $0xa0] sm:$0xff]  ;;  %4104 = vst [vmem:[#allocation14_spill] sm:$0xff] %v4103_v59  ;;  %1259 = vst.msk [vmem:[#allocation3 + $0x4] ss:$8 sm:$0xf] %vm3321_vm3, %v3257_v16 }
  0x46   :  { %2755 = vmatpush1.bf16.msra.mxu0 %v2754_v43  ;;  %v2764_v50 = vpack.c.bf16 %v237_v48, %v224_v47  ;;  %v2772_v52 = vpack.c.bf16 %v239_v51, %v226_v49  ;;  %v3318_v58 = vld [vmem:[%s4092_s4 + $0x1] ss:$4 sm:$0xf]  ;;  %v3328_v60 = vld [vmem:[%s4092_s4 + $0x2] ss:$4 sm:$0xf]  ;;  %v3369_v15 = vsub.s32 %v1021_v61, %v3252_v11 }
  0x47   :  { %vm863_vm4 = vcmp.ge.f32.partialorder %v3318_v58, 1.0  ;;  %vm864_vm6 = vcmp.ge.f32.partialorder %v3328_v60, 1.0  ;;  %vm1056_vm8 = vcmp.lt.s32.totalorder %v3313_v57, 16  ;;  %vm870_vm9 = vcmp.lt.f32.partialorder %v3328_v60, 15.0  ;;  %v241_v6 = vld [vmem:[#allocation9 + $0xb0] sm:$0xff]  ;;  %v243_v59 = vld [vmem:[#allocation9 + $0xc0] sm:$0xff] }
  0x48   :  { %2765 = vmatprep.subr.bf16.mxu0 %v2764_v50  ;;  %vm865_vm7 = vmand %vm863_vm4, %vm864_vm6  ;;  %v2705_v2 = vsel %vm863_vm4, 1.0, %v4097_v0  ;;  %4105 = vst [vmem:[#allocation15_spill] sm:$0xff] %v3369_v15  ;;  %vm1126_vm11 = vcmp.lt.s32.totalorder %v3313_v57, 15  ;;  %vm1196_vm12 = vcmp.lt.s32.totalorder %v3313_v57, 1  ;;  %vm1269_vm13 = vcmp.lt.s32.totalorder %v3313_v57, 127 }
  0x49   :  { %1050 = vrot.lane.b32.xlu1 %v960_v26, %s3136_s18  ;;  %1048 = vrot.lane.b32.xlu0 %v956_v24, %s3136_s18  ;;  %v2704_v63 = vsel %vm865_vm7, 1.0, %v4097_v0  ;;  %v3382_v29 = vrot.slane %v2705_v2, %v3260_v19  ;;  %vm871_vm10 = vmand %vm863_vm4, %vm870_vm9  ;;  %vm878_vm14 = vcmp.lt.f32.partialorder %v3318_v58, 15.0  ;;  %vm1339_vm1 = vcmp.lt.s32.totalorder %v3313_v57, 113 }
  0x4a   :  { %v3350_v5 = vrot.slane %v2704_v63, %v3263_v20  ;;  %v3353_v7 = vrot.slane %v2704_v63, %v3266_v21  ;;  %v3360_v10 = vrot.slane %v2704_v63, %v3269_v22  ;;  %v3363_v12 = vrot.slane %v2704_v63, %v3260_v19  ;;  %vm879_vm15 = vmand %vm878_vm14, %vm864_vm6 }
  0x4b   :  { %v2706_v39 = vsel %vm871_vm10, 1.0, %v4097_v0  ;;  %vm884_vm4 = vmand %vm878_vm14, %vm870_vm9  ;;  %vm346_vm7 = vcmask 261120  }
  0x4c   :  { %v3407_v49 = vrot.slane %v2706_v39, %v3269_v22  ;;  %v3412_v51 = vrot.slane %v2706_v39, %v3263_v20  ;;  %v3419_v54 = vrot.slane %v2706_v39, %v3260_v19  ;;  %v2711_v60 = vsel %vm884_vm4, 1.0, %v4097_v0 }
  0x4d   :  { %1054 = vrot.lane.b32.xlu1 %v968_v25, %s3136_s18  ;;  %1052 = vrot.lane.b32.xlu0 %v964_v23, %s3136_s18 }
  0x51   :  { %1120 = vrot.lane.b32.xlu1 %v960_v26, %s3137_s19  ;;  %1118 = vrot.lane.b32.xlu0 %v956_v24, %s3137_s19 }
  0x55   :  { %1124 = vrot.lane.b32.xlu1 %v968_v25, %s3137_s19  ;;  %1122 = vrot.lane.b32.xlu0 %v964_v23, %s3137_s19 }
  0x59   :  { %1190 = vrot.lane.b32.xlu1 %v960_v26, %s3138_s20  ;;  %1188 = vrot.lane.b32.xlu0 %v956_v24, %s3138_s20 }
  0x5d   :  { %1194 = vrot.lane.b32.xlu1 %v968_v25, %s3138_s20  ;;  %1192 = vrot.lane.b32.xlu0 %v964_v23, %s3138_s20 }
  0x61   :  { %1263 = vrot.lane.b32.xlu1 %v960_v26, %s3139_s21  ;;  %1261 = vrot.lane.b32.xlu0 %v956_v24, %s3139_s21 }
  0x65   :  { %1267 = vrot.lane.b32.xlu1 %v968_v25, %s3139_s21  ;;  %1265 = vrot.lane.b32.xlu0 %v964_v23, %s3139_s21 }
  0x69   :  { %1333 = vrot.lane.b32.xlu1 %v960_v26, %s3140_s1  ;;  %1331 = vrot.lane.b32.xlu0 %v956_v24, %s3140_s1 }
  0x6d   :  { %1337 = vrot.lane.b32.xlu1 %v968_v25, %s3140_s1  ;;  %1335 = vrot.lane.b32.xlu0 %v964_v23, %s3140_s1 }
  0x71   :  { %1403 = vrot.lane.b32.xlu1 %v960_v26, %s3141_s22  ;;  %1401 = vrot.lane.b32.xlu0 %v956_v24, %s3141_s22 }
  0x75   :  { %1407 = vrot.lane.b32.xlu1 %v968_v25, %s3141_s22  ;;  %1405 = vrot.lane.b32.xlu0 %v964_v23, %s3141_s22 }
  0x79   :  { %1473 = vrot.lane.b32.xlu1 %v960_v26, %s3142_s23  ;;  %1471 = vrot.lane.b32.xlu0 %v956_v24, %s3142_s23  ;;  %v3374_v24 = vrot.slane %v2705_v2, %v3269_v22  ;;  %v3379_v26 = vrot.slane %v2705_v2, %v3263_v20 }
  0x7d   :  { %1477 = vrot.lane.b32.xlu1 %v968_v25, %s3142_s23  ;;  %1475 = vrot.lane.b32.xlu0 %v964_v23, %s3142_s23 }
  0xb3   :  { %v978_v55 = vpop.permute.xlu1 %977  ;;  %v974_v56 = vpop.permute.xlu0 %973 }
  0xb7   :  { %v980_v62 = vpop.permute.xlu1 %979  ;;  %v976_v1 = vpop.permute.xlu0 %975 }
  0xb8   :  { %v984_v3 = vsel %vm983_vm5, %v978_v55, %v980_v62  ;;  %v987_v4 = vsel %vm983_vm5, %v980_v62, %v974_v56  ;;  %v985_v8 = vsel %vm983_vm5, %v976_v1, %v978_v55  ;;  %v986_v9 = vsel %vm983_vm5, %v974_v56, %v976_v1 }
  0xb9   :  { %v1009_v13 = vmul.f32 %v3350_v5, %v987_v4  ;;  %v1012_v14 = vmul.f32 %v3353_v7, %v984_v3  ;;  %v1010_v16 = vmul.f32 %v3360_v10, %v986_v9  ;;  %v1011_v17 = vmul.f32 %v3363_v12, %v985_v8 }
  0xba   :  { %v3422_v55 = vrot.slane %v2706_v39, %v3266_v21  ;;  %v2707_v4 = vsel %vm864_vm6, 1.0, %v4097_v0  ;;  %vm1479_vm6 = vcmp.lt.s32.totalorder %v3313_v57, 111 }
  0xbb   :  { %v1051_v18 = vpop.permute.xlu1 %1050  ;;  %v1049_v23 = vpop.permute.xlu0 %1048  ;;  %v1018_v28 = vcombine.low %v1011_v17, %v1012_v14 }
  0xbc   :  { %v1059_v25 = vsel %vm1056_vm8, %v1049_v23, %v1051_v18 }
  0xbf   :  { %v1053_v35 = vpop.permute.xlu0 %1052 }
  0xc0   :  { %v1058_v38 = vsel %vm1056_vm8, %v1051_v18, %v1053_v35 }
  0xc3   :  { %v1119_v48 = vpop.permute.xlu0 %1118 }
  0xc7   :  { %v1123_v63 = vpop.permute.xlu0 %1122 }
 0x10e   :  { %v136_v30 = vpop.f32.mrb[0].mxu1 }
 0x10f   :  { %v137_v31 = vadd.f32 %v136_v30, %v65_v27  ;;  %v2726_v32 = vpop.f32.mrb[1].mxu1  ;;  %v1017_v27 = vcombine.low %v1009_v13, %v1010_v16  ;;  %v3385_v30 = vrot.slane %v2705_v2, %v3266_v21 }
 0x110   :  { %v1032_v32 = vrot.slane %v1018_v28, %v3369_v15  ;;  %v3447_v28 = vrot.slane %v2707_v4, %v3263_v20 }
 0x111   :  { %v140_v34 = vmax.f32 %v137_v31, 0.0  ;;  %v1025_v31 = vrot.slane %v1017_v27, %v3369_v15 }
 0x113   :  { %2732 = vmatmul.mubr.msk.f32.vlgmr.msra.gmra.mrb[2].mxu1 %vm144_vm2, %v140_v34  ;;  %v1055_v34 = vpop.permute.xlu1 %1054  ;;  %v1033_v40 = vcombine.low %v1025_v31, %v1032_v32  ;;  %vm1409_vm2 = vcmp.lt.s32.totalorder %v3313_v57, 112 }
 0x114   :  { %2759 = vmatpush1.bf16.msra.mxu1 %v2758_v33  ;;  %485 = vmatprep.mubr.f32.mxu1 %v4097_v0  ;;  %v1083_v33 = vmul.f32 %v3374_v24, %v1059_v25  ;;  %v1060_v36 = vsel %vm1056_vm8, %v1055_v34, %v1049_v23  ;;  %v1057_v37 = vsel %vm1056_vm8, %v1053_v35, %v1055_v34  ;;  %v1189_v23 = vpop.permute.xlu0 %1188 }
 0x115   :  { %2761 = vmatprep.subr.bf16.mxu1 %v2760_v42  ;;  %v1082_v41 = vmul.f32 %v3379_v26, %v1060_v36  ;;  %v1084_v42 = vmul.f32 %v3382_v29, %v1058_v38  ;;  %v1085_v43 = vmul.f32 %v3385_v30, %v1057_v37  ;;  %v1040_v44 = vrot.slane %v1033_v40, %v3369_v15 }
 0x116   :  { %v3442_v25 = vrot.slane %v2707_v4, %v3269_v22  ;;  %v3455_v34 = vrot.slane %v2707_v4, %v3266_v21 }
 0x117   :  { %v1090_v45 = vcombine.low %v1082_v41, %v1083_v33  ;;  %v1121_v47 = vpop.permute.xlu1 %1120  ;;  %1046 = vst.msk [vmem:[#allocation3] ss:$8 sm:$0xf] %vm3321_vm3, %v1040_v44  ;;  %v3452_v33 = vrot.slane %v2707_v4, %v3260_v19 }
 0x118   :  { %2763 = vmatpush1.bf16.msra.mxu1 %v2762_v46  ;;  %v1091_v46 = vcombine.low %v1084_v42, %v1085_v43  ;;  %v1129_v50 = vsel %vm1126_vm11, %v1119_v48, %v1121_v47  ;;  %v1128_v3 = vsel %vm1126_vm11, %v1121_v47, %v1123_v63  ;;  %v1193_v38 = vpop.permute.xlu0 %1192  ;;  %v2708_v42 = vsel %vm870_vm9, 1.0, %v4097_v0 }
 0x119   :  { %2773 = vmatprep.subr.bf16.mxu1 %v2772_v52  ;;  %v1098_v52 = vrot.slane %v1090_v45, %v3369_v15  ;;  %v1153_v61 = vmul.f32 %v3407_v49, %v1129_v50  ;;  %v1154_v13 = vmul.f32 %v3419_v54, %v1128_v3 }
 0x11a   :  { %v1105_v53 = vrot.slane %v1091_v46, %v3369_v15 }
 0x11b   :  { %v1125_v62 = vpop.permute.xlu1 %1124 }
 0x11c   :  { %v1106_v56 = vcombine.low %v1098_v52, %v1105_v53  ;;  %v1130_v1 = vsel %vm1126_vm11, %v1125_v62, %v1119_v48  ;;  %v1127_v2 = vsel %vm1126_vm11, %v1123_v63, %v1125_v62  ;;  %v1262_v52 = vpop.permute.xlu0 %1261  ;;  %v3476_v53 = vrot.slane %v2708_v42, %v3263_v20 }
 0x11d   :  { %v1152_v9 = vmul.f32 %v3412_v51, %v1130_v1  ;;  %v1155_v14 = vmul.f32 %v3422_v55, %v1127_v2  ;;  %v3486_v1 = vrot.slane %v2708_v42, %v3269_v22  ;;  %v3489_v2 = vrot.slane %v2708_v42, %v3260_v19 }
 0x11e   :  { %v1113_v8 = vrot.slane %v1106_v56, %v3369_v15 }
 0x11f   :  { %v1160_v16 = vcombine.low %v1152_v9, %v1153_v61  ;;  %v1161_v17 = vcombine.low %v1154_v13, %v1155_v14  ;;  %v1191_v18 = vpop.permute.xlu1 %1190  ;;  %v3481_v61 = vrot.slane %v2708_v42, %v3266_v21 }
 0x120   :  { %1116 = vst.msk [vmem:[#allocation3 + $0x1] ss:$8 sm:$0xf] %vm3321_vm3, %v1113_v8  ;;  %v1199_v27 = vsel %vm1196_vm12, %v1189_v23, %v1191_v18  ;;  %v1198_v41 = vsel %vm1196_vm12, %v1191_v18, %v1193_v38  ;;  %v1266_v9 = vpop.permute.xlu0 %1265 }
 0x121   :  { %v1168_v31 = vrot.slane %v1160_v16, %v3369_v15  ;;  %v1175_v32 = vrot.slane %v1161_v17, %v3369_v15  ;;  %v1223_v36 = vmul.f32 %v3442_v25, %v1199_v27  ;;  %v1224_v45 = vmul.f32 %v3452_v33, %v1198_v41 }
 0x122   :  { %v2709_v17 = vsel %vm879_vm15, 1.0, %v4097_v0 }
 0x123   :  { %v1176_v35 = vcombine.low %v1168_v31, %v1175_v32  ;;  %v1195_v37 = vpop.permute.xlu1 %1194 }
 0x124   :  { %v1200_v39 = vsel %vm1196_vm12, %v1195_v37, %v1189_v23  ;;  %v1197_v40 = vsel %vm1196_vm12, %v1193_v38, %v1195_v37  ;;  %v1332_v37 = vpop.permute.xlu0 %1331  ;;  %v3511_v38 = vrot.slane %v2709_v17, %v3263_v20 }
 0x125   :  { %v1183_v43 = vrot.slane %v1176_v35, %v3369_v15  ;;  %v1222_v44 = vmul.f32 %v3447_v28, %v1200_v39  ;;  %v1225_v46 = vmul.f32 %v3455_v34, %v1197_v40  ;;  %v3516_v40 = vrot.slane %v2709_v17, %v3266_v21 }
 0x127   :  { %1186 = vst.msk [vmem:[#allocation3 + $0x2] ss:$8 sm:$0xf] %vm3321_vm3, %v1183_v43  ;;  %v1230_v47 = vcombine.low %v1222_v44, %v1223_v36  ;;  %v1231_v48 = vcombine.low %v1224_v45, %v1225_v46  ;;  %v1264_v50 = vpop.permute.xlu1 %1263  ;;  %v3521_v43 = vrot.slane %v2709_v17, %v3269_v22  ;;  %v3524_v44 = vrot.slane %v2709_v17, %v3260_v19 }
 0x128   :  { %v1272_v56 = vsel %vm1269_vm13, %v1262_v52, %v1264_v50  ;;  %v1271_v16 = vsel %vm1269_vm13, %v1264_v50, %v1266_v9 }
 0x129   :  { %v1238_v62 = vrot.slane %v1230_v47, %v3369_v15  ;;  %v1245_v63 = vrot.slane %v1231_v48, %v3369_v15  ;;  %v1295_v4 = vmul.f32 %v3476_v53, %v1272_v56  ;;  %v1296_v27 = vmul.f32 %v3486_v1, %v1271_v16  ;;  %v1336_v48 = vpop.permute.xlu0 %1335 }
 0x12b   :  { %v1246_v3 = vcombine.low %v1238_v62, %v1245_v63  ;;  %v1268_v8 = vpop.permute.xlu1 %1267  ;;  %v1303_v32 = vcombine.low %v1295_v4, %v1296_v27  ;;  %v2710_v62 = vsel %vm878_vm14, 1.0, %v4097_v0  ;;  %v230_v0 = vld [vmem:[#allocation9 + $0x58] sm:$0xff] }
 0x12c   :  { %v1273_v13 = vsel %vm1269_vm13, %v1268_v8, %v1262_v52  ;;  %v1270_v14 = vsel %vm1269_vm13, %v1266_v9, %v1268_v8  ;;  %v3544_v17 = vrot.slane %v2710_v62, %v3263_v20 }
 0x12d   :  { %v1253_v18 = vrot.slane %v1246_v3, %v3369_v15  ;;  %v1298_v23 = vmul.f32 %v3481_v61, %v1273_v13  ;;  %v1297_v31 = vmul.f32 %v3489_v2, %v1270_v14  ;;  %v1311_v41 = vrot.slane %v1303_v32, %v3369_v15  ;;  %v1402_v16 = vpop.permute.xlu0 %1401 }
 0x12e   :  { %v3554_v32 = vrot.slane %v2710_v62, %v3269_v22 }
 0x12f   :  { %1256 = vst.msk [vmem:[#allocation3 + $0x3] ss:$8 sm:$0xf] %vm3321_vm3, %v1253_v18  ;;  %v1304_v35 = vcombine.low %v1297_v31, %v1298_v23  ;;  %v1334_v36 = vpop.permute.xlu1 %1333  ;;  %v3549_v23 = vrot.slane %v2710_v62, %v3266_v21 }
 0x130   :  { %v1342_v39 = vsel %vm1339_vm1, %v1332_v37, %v1334_v36  ;;  %v1341_v56 = vsel %vm1339_vm1, %v1334_v36, %v1336_v48 }
 0x131   :  { %v1318_v42 = vrot.slane %v1304_v35, %v3369_v15  ;;  %v1365_v46 = vmul.f32 %v3511_v38, %v1342_v39  ;;  %v1366_v4 = vmul.f32 %v3521_v43, %v1341_v56  ;;  %v3557_v35 = vrot.slane %v2710_v62, %v3260_v19 }
 0x133   :  { %v1319_v45 = vcombine.low %v1311_v41, %v1318_v42  ;;  %v1338_v47 = vpop.permute.xlu1 %1337  ;;  %v1373_v9 = vcombine.low %v1365_v46, %v1366_v4  ;;  %v1406_v41 = vpop.permute.xlu0 %1405 }
 0x134   :  { %v1343_v50 = vsel %vm1339_vm1, %v1338_v47, %v1332_v37  ;;  %v1340_v52 = vsel %vm1339_vm1, %v1336_v48, %v1338_v47 }
 0x135   :  { %v1326_v63 = vrot.slane %v1319_v45, %v3369_v15  ;;  %v1368_v3 = vmul.f32 %v3516_v40, %v1343_v50  ;;  %v1367_v8 = vmul.f32 %v3524_v44, %v1340_v52  ;;  %v1381_v27 = vrot.slane %v1373_v9, %v3369_v15 }
 0x137   :  { %1329 = vst.msk [vmem:[#allocation3 + $0x5] ss:$8 sm:$0xf] %vm3321_vm3, %v1326_v63  ;;  %v1374_v13 = vcombine.low %v1367_v8, %v1368_v3  ;;  %v1404_v14 = vpop.permute.xlu1 %1403  ;;  %v1472_v63 = vpop.permute.xlu0 %1471  ;;  %v3579_v3 = vrot.slane %v2711_v60, %v3263_v20  ;;  %v3584_v8 = vrot.slane %v2711_v60, %v3266_v21 }
 0x138   :  { %v1412_v18 = vsel %vm1409_vm2, %v1402_v16, %v1404_v14  ;;  %v1411_v46 = vsel %vm1409_vm2, %v1404_v14, %v1406_v41  ;;  %v3589_v14 = vrot.slane %v2711_v60, %v3269_v22 }
 0x139   :  { %v1388_v31 = vrot.slane %v1374_v13, %v3369_v15  ;;  %v1435_v37 = vmul.f32 %v3544_v17, %v1412_v18  ;;  %v1436_v48 = vmul.f32 %v3554_v32, %v1411_v46 }
 0x13b   :  { %v1389_v36 = vcombine.low %v1381_v27, %v1388_v31  ;;  %v1408_v39 = vpop.permute.xlu1 %1407  ;;  %v1443_v52 = vcombine.low %v1435_v37, %v1436_v48 }
 0x13c   :  { %v1413_v42 = vsel %vm1409_vm2, %v1408_v39, %v1402_v16  ;;  %v1410_v45 = vsel %vm1409_vm2, %v1406_v41, %v1408_v39  ;;  %v3592_v16 = vrot.slane %v2711_v60, %v3260_v19 }
 0x13d   :  { %v1396_v58 = vrot.slane %v1389_v36, %v3369_v15  ;;  %v1438_v47 = vmul.f32 %v3549_v23, %v1413_v42  ;;  %v1437_v50 = vmul.f32 %v3557_v35, %v1410_v45  ;;  %v1451_v9 = vrot.slane %v1443_v52, %v3369_v15  ;;  %v1476_v36 = vpop.permute.xlu0 %1475 }
 0x13f   :  { %1399 = vst.msk [vmem:[#allocation3 + $0x6] ss:$8 sm:$0xf] %vm3321_vm3, %v1396_v58  ;;  %v1444_v56 = vcombine.low %v1437_v50, %v1438_v47  ;;  %v1474_v62 = vpop.permute.xlu1 %1473 }
 0x140   :  { %v1482_v4 = vsel %vm1479_vm6, %v1472_v63, %v1474_v62  ;;  %v1481_v41 = vsel %vm1479_vm6, %v1474_v62, %v1476_v36  ;;  %v143_v62 = vld [vmem:[%s4090_s2 + $0x10] sm:$0x1] }
 0x141   :  { %v1458_v13 = vrot.slane %v1444_v56, %v3369_v15  ;;  %v1505_v27 = vmul.f32 %v3579_v3, %v1482_v4  ;;  %v1506_v46 = vmul.f32 %v3589_v14, %v1481_v41  ;;  %v236_v4 = vld [vmem:[#allocation9 + $0x88] sm:$0xff] }
 0x143   :  { %v1459_v18 = vcombine.low %v1451_v9, %v1458_v13  ;;  %v1478_v31 = vpop.permute.xlu1 %1477  ;;  %v1513_v58 = vcombine.low %v1505_v27, %v1506_v46  ;;  %v225_v9 = vld [vmem:[#allocation9 + $0x30] sm:$0xff]  ;;  %v238_v13 = vld [vmem:[#allocation9 + $0x98] sm:$0xff] }
 0x144   :  { %v1483_v37 = vsel %vm1479_vm6, %v1478_v31, %v1472_v63  ;;  %v1480_v39 = vsel %vm1479_vm6, %v1476_v36, %v1478_v31  ;;  %v223_v63 = vld [vmem:[#allocation9 + $0x20] sm:$0xff]  ;;  %v252_v36 = vld [vmem:[#allocation9 + $0x108] sm:$0xff]  ;;  %v249_v46 = vld [vmem:[#allocation9 + $0xf0] sm:$0xff] }
 0x145   :  { %v1466_v42 = vrot.slane %v1459_v18, %v3369_v15  ;;  %v1508_v45 = vmul.f32 %v3584_v8, %v1483_v37  ;;  %v1507_v60 = vmul.f32 %v3592_v16, %v1480_v39  ;;  %v1521_v48 = vrot.slane %v1513_v58, %v3369_v15  ;;  %v250_v18 = vld [vmem:[#allocation9 + $0xf8] sm:$0xff]  ;;  %v263_v31 = vld [vmem:[#allocation9 + $0x160] sm:$0xff]  ;;  %v265_v37 = vld [vmem:[#allocation9 + $0x170] sm:$0xff] }
 0x147   :  { %1469 = vst.msk [vmem:[#allocation3 + $0x7] ss:$8 sm:$0xf] %vm3321_vm3, %v1466_v42  ;;  %v1514_v47 = vcombine.low %v1507_v60, %v1508_v45  ;;  %v2766_v42 = vpack.c.bf16 %v236_v4, %v223_v63  ;;  %v2774_v45 = vpack.c.bf16 %v238_v13, %v225_v9  ;;  %v262_v60 = vld [vmem:[#allocation9 + $0x158] sm:$0xff]  ;;  %v227_v4 = vld [vmem:[#allocation9 + $0x40] sm:$0xff]  ;;  %v240_v9 = vld [vmem:[#allocation9 + $0xa8] sm:$0xff] }
 0x149   :  { %v1528_v50 = vrot.slane %v1514_v47, %v3369_v15  ;;  %v2768_v47 = vpack.c.bf16 %v263_v31, %v250_v18  ;;  %v2788_v18 = vpack.c.bf16 %v243_v59, %v230_v0  ;;  %v242_v31 = vld [vmem:[#allocation9 + $0xb8] sm:$0xff]  ;;  %v255_v59 = vld [vmem:[#allocation9 + $0x120] sm:$0xff] }
 0x14a   :  { %v266_v0 = vld [vmem:[#allocation9 + $0x178] sm:$0xff] }
 0x14b   :  { %v1529_v52 = vcombine.low %v1521_v48, %v1528_v50  ;;  %v2776_v48 = vpack.c.bf16 %v265_v37, %v252_v36  ;;  %v251_v50 = vld [vmem:[#allocation9 + $0x100] sm:$0xff]  ;;  %v254_v36 = vld [vmem:[#allocation9 + $0x118] sm:$0xff]  ;;  %v4106_v37 = vmov 0.0  }
 0x14d   :  { %v1536_v56 = vrot.slane %v1529_v52, %v3369_v15  ;;  %v264_v52 = vld [vmem:[#allocation9 + $0x168] sm:$0xff]  ;;  %v269_v15 = vld [vmem:[#allocation9 + $0x190] sm:$0xff] }
 0x14e   :  { %v2778_v63 = vpack.c.bf16 %v264_v52, %v251_v50 }
 0x14f   :  { %1539 = vst.msk [vmem:[#allocation3 + $0x20] ss:$8 sm:$0xf] %vm3321_vm3, %v1536_v56  ;;  %v228_v56 = vld [vmem:[#allocation9 + $0x48] sm:$0xff] }
 0x150   :  { %v2780_v13 = vpack.c.bf16 %v241_v6, %v228_v56 }
 0x156   :  { %v1547_v50 = vld [vmem:[#allocation3 + $0x28] sm:$0xff] }
 0x1e6   :  { %v214_v27 = vpop.f32.mrb[2].mxu1 }
 0x1e7   :  { %v215_v39 = vadd.f32 %v214_v27, %v143_v62  ;;  %v2733_v41 = vpop.f32.mrb[3].mxu1  ;;  %v2770_v62 = vpack.c.bf16 %v262_v60, %v249_v46  ;;  %v229_v27 = vld [vmem:[#allocation9 + $0x50] sm:$0xff] }
 0x1e8   :  { %v256_v41 = vld [vmem:[#allocation9 + $0x128] sm:$0xff]  ;;  %v253_v46 = vld [vmem:[#allocation9 + $0x110] sm:$0xff] }
 0x1e9   :  { %v3615_v58 = vmax.f32 %v215_v39, 0.0  ;;  %v267_v39 = vld [vmem:[#allocation9 + $0x180] sm:$0xff]  ;;  %v2792_v6 = vpack.c.bf16 %v269_v15, %v256_v41  ;;  %v2786_v52 = vpack.c.bf16 %v266_v0, %v253_v46 }
 0x1ea   :  { %v2784_v60 = vpack.c.bf16 %v267_v39, %v254_v36  ;;  %v1545_v39 = vld [vmem:[#allocation3 + $0x18] sm:$0xff]  ;;  %v1544_v46 = vld [vmem:[#allocation3 + $0x10] sm:$0xff] }
 0x1eb   :  { %2695 = vmatmul.mubr.msk.f32.vlgmr.msra.gmra.mrb[0].mxu0 %vm346_vm7, %v3615_v58  ;;  %2696 = vmatmul.mubr.msk.f32.vlgmr.msra.gmra.mrb[4].mxu1 %vm346_vm7, %v3615_v58  ;;  %v1549_v41 = vld [vmem:[#allocation3 + $0x38] sm:$0xff] }
 0x1ec   :  { %2767 = vmatpush1.bf16.msra.mxu0 %v2766_v42  ;;  %2775 = vmatpush1.bf16.msra.mxu1 %v2774_v45  ;;  %v2782_v42 = vpack.c.bf16 %v240_v9, %v227_v4  ;;  %v2790_v45 = vpack.c.bf16 %v242_v31, %v229_v27  ;;  %v1542_v4 = vld [vmem:[#allocation3] sm:$0xff]  ;;  %v270_v31 = vld [vmem:[#allocation9 + $0x198] sm:$0xff] }
 0x1ed   :  { %2769 = vmatprep.subr.bf16.mxu0 %v2768_v47  ;;  %2777 = vmatprep.subr.bf16.mxu1 %v2776_v48  ;;  %v268_v47 = vld [vmem:[#allocation9 + $0x188] sm:$0xff]  ;;  %v1543_v48 = vld [vmem:[#allocation3 + $0x8] sm:$0xff] }
 0x1ee   :  { %556 = vmatprep.mubr.f32.mxu0 %v4106_v37  ;;  %627 = vmatprep.mubr.f32.mxu1 %v4106_v37  ;;  %v2794_v56 = vpack.c.bf16 %v268_v47, %v255_v59  ;;  %v2802_v15 = vpack.c.bf16 %v1547_v50, %v1543_v48  ;;  %v1546_v9 = vld [vmem:[#allocation3 + $0x20] sm:$0xff] }
 0x1ef   :  { %v257_v27 = vld [vmem:[#allocation9 + $0x130] sm:$0xff]  ;;  %v2804_v36 = vpack.c.bf16 %v1546_v9, %v1542_v4  ;;  %v299_v9 = vsub.s32 4, %v3252_v11 }
 0x1f0   :  { %2771 = vmatpush1.bf16.msra.mxu0 %v2770_v62  ;;  %2779 = vmatpush1.bf16.msra.mxu1 %v2778_v63  ;;  %v231_v62 = vld [vmem:[#allocation9 + $0x60] sm:$0xff]  ;;  %v244_v63 = vld [vmem:[#allocation9 + $0xc8] sm:$0xff] }
 0x1f1   :  { %2781 = vmatprep.subr.bf16.mxu0 %v2780_v13  ;;  %2789 = vmatprep.subr.bf16.mxu1 %v2788_v18  ;;  %v2797_v13 = vpack.c.bf16 %v244_v63, %v231_v62  ;;  %v4107_v18 = vmov 0.0|0.0  }
 0x1f3   :  { %2697 = vmatmul.mubr.msk.f32.vlgmr.msra.gmra.mrb[2].mxu0 %vm346_vm7, %v3615_v58  ;;  %2698 = vmatmul.mubr.msk.f32.vlgmr.msra.gmra.mrb[6].mxu1 %vm346_vm7, %v3615_v58 }
 0x1f4   :  { %2783 = vmatpush1.bf16.msra.mxu0 %v2782_v42  ;;  %2791 = vmatpush1.bf16.msra.mxu1 %v2790_v45  ;;  %v2800_v42 = vpack.c.bf16 %v270_v31, %v257_v27  ;;  %v2834_v45 = vpack.c.bf16 %v1549_v41, %v1545_v39  ;;  %v311_v39 = vsub.s32 7, %v3252_v11 }
 0x1f5   :  { %2785 = vmatprep.subr.bf16.mxu0 %v2784_v60  ;;  %2793 = vmatprep.subr.bf16.mxu1 %v2792_v6  ;;  %v1548_v60 = vld [vmem:[#allocation3 + $0x30] sm:$0xff] }
 0x1f6   :  { %698 = vmatprep.mubr.f32.mxu0 %v4106_v37  ;;  %769 = vmatprep.mubr.f32.mxu1 %v4106_v37  ;;  %v2836_v6 = vpack.c.bf16 %v1548_v60, %v1544_v46  ;;  %v276_v60 = vld [vmem:[#allocation9 + $0x1e0] ss:$8 sm:$0xf] }
 0x1f8   :  { %2787 = vmatpush1.bf16.msra.mxu0 %v2786_v52  ;;  %2795 = vmatpush1.bf16.msra.mxu1 %v2794_v56 }
 0x1f9   :  { %2796 = vmatprep.subr.bf16.mxu0 %v4107_v18  ;;  %2803 = vmatprep.subr.bf16.mxu1 %v2802_v15 }
 0x1fb   :  { %2699 = vmatmul.mubr.msk.f32.vlgmr.msra.gmra.mrb[4].mxu0 %vm346_vm7, %v3615_v58  ;;  %2700 = vmatmul.mubr.msk.f32.vlgmr.msra.gmra.mrb[8].mxu1 %vm346_vm7, %v3615_v58 }
 0x1fc   :  { %2798 = vmatpush3.bf16.msra.mxu0 %v2797_v13  ;;  %2742 = vmatprep.mubr.msk.f32.mxu0 %vm3133_vm0, %v4106_v37  ;;  %v307_v13 = vsub.s32 6, %v3252_v11  ;;  %vm1750_vm0 = vcmask 1043456  }
 0x1fd   :  { %2799 = vmatprep.subr.bf16.mxu0 %v4107_v18  ;;  %2805 = vmatpush1.bf16.msra.mxu1 %v2804_v36  ;;  %v303_v36 = vsub.s32 5, %v3252_v11 }
 0x1fe   :  { %2807 = vmatprep.subr.bf16.mxu1 %v4107_v18  ;;  %1670 = vmatprep.mubr.f32.mxu1 %v4106_v37 }
 0x200   :  { %2801 = vmatpush3.bf16.msra.mxu0 %v2800_v42 }
 0x201   :  { %2835 = vmatprep.subr.bf16.mxu0 %v2834_v45  ;;  %2809 = vmatpush1.bf16.msra.mxu1 %v4107_v18 }
 0x202   :  { %2811 = vmatprep.subr.bf16.mxu1 %v4107_v18 }
 0x203   :  { %2743 = vmatmul.mubr.msk.f32.vlgmr.msra.gmra.mrb[6].mxu0 %vm346_vm7, %v3615_v58  ;;  %v272_v58 = vld [vmem:[#allocation9 + $0x1a0] ss:$8 sm:$0xf] }
 0x204   :  { %2837 = vmatpush1.bf16.msra.mxu0 %v2836_v6  ;;  %1741 = vmatprep.mubr.f32.mxu0 %v4106_v37  ;;  %v273_v37 = vld [vmem:[#allocation9 + $0x1a0] ss:$8 sm:$0xf0] }
 0x205   :  { %2839 = vmatprep.subr.bf16.mxu0 %v4107_v18  ;;  %2813 = vmatpush1.bf16.msra.mxu1 %v4107_v18  ;;  %v274_v0 = vor.u32 %v273_v37, %v272_v58  ;;  %v277_v6 = vld [vmem:[#allocation9 + $0x1e0] ss:$8 sm:$0x10] }
 0x206   :  { %2815 = vmatprep.subr.bf16.mxu1 %v4107_v18 }
 0x207   :  { %v284_v59 = vrot.slane %v274_v0, %v3263_v20  ;;  %v292_v47 = vrot.slane %v274_v0, %v3260_v19  ;;  %v288_v48 = vrot.slane %v274_v0, %v3269_v22  ;;  %v296_v50 = vrot.slane %v274_v0, %v3266_v21 }
 0x208   :  { %2841 = vmatpush1.bf16.msra.mxu0 %v4107_v18  ;;  %v300_v41 = vrot.slane %v274_v0, %v299_v9  ;;  %v308_v42 = vrot.slane %v274_v0, %v307_v13  ;;  %v304_v45 = vrot.slane %v274_v0, %v303_v36  ;;  %v312_v46 = vrot.slane %v274_v0, %v311_v39 }
 0x209   :  { %2843 = vmatprep.subr.bf16.mxu0 %v4107_v18  ;;  %2817 = vmatpush1.bf16.msra.mxu1 %v4107_v18 }
 0x20a   :  { %2819 = vmatprep.subr.bf16.mxu1 %v4107_v18 }
 0x20c   :  { %2845 = vmatpush1.bf16.msra.mxu0 %v4107_v18 }
 0x20d   :  { %2847 = vmatprep.subr.bf16.mxu0 %v4107_v18  ;;  %2821 = vmatpush1.bf16.msra.mxu1 %v4107_v18 }
 0x20e   :  { %2823 = vmatprep.subr.bf16.mxu1 %v4107_v18 }
 0x210   :  { %2849 = vmatpush1.bf16.msra.mxu0 %v4107_v18 }
 0x211   :  { %2851 = vmatprep.subr.bf16.mxu0 %v4107_v18  ;;  %2825 = vmatpush1.bf16.msra.mxu1 %v4107_v18 }
 0x212   :  { %2827 = vmatprep.subr.bf16.mxu1 %v4107_v18 }
 0x214   :  { %2853 = vmatpush1.bf16.msra.mxu0 %v4107_v18 }
 0x215   :  { %2855 = vmatprep.subr.bf16.mxu0 %v4107_v18  ;;  %2829 = vmatpush1.bf16.msra.mxu1 %v4107_v18 }
 0x216   :  { %2831 = vmatprep.subr.bf16.mxu1 %v4107_v18 }
 0x218   :  { %2857 = vmatpush1.bf16.msra.mxu0 %v4107_v18 }
 0x219   :  { %2859 = vmatprep.subr.bf16.mxu0 %v4107_v18  ;;  %2833 = vmatpush1.bf16.msra.mxu1 %v4107_v18 }
 0x21c   :  { %2861 = vmatpush1.bf16.msra.mxu0 %v4107_v18 }
 0x21d   :  { %2863 = vmatprep.subr.bf16.mxu0 %v4107_v18 }
 0x220   :  { %2865 = vmatpush1.bf16.msra.mxu0 %v4107_v18 }
 0x2be   :  { %v416_v52 = vpop.f32.mrb[0].mxu0  ;;  %v487_v56 = vpop.f32.mrb[4].mxu1 }
 0x2bf   :  { %v417_v62 = vadd.f32 %v416_v52, %v284_v59  ;;  %v488_v63 = vadd.f32 %v487_v56, %v292_v47  ;;  %v418_v15 = vpop.f32.mrb[1].mxu0  ;;  %v489_v4 = vpop.f32.mrb[5].mxu1  ;;  %v278_v52 = vor.u32 %v277_v6, %v276_v60 }
 0x2c0   :  { %v419_v27 = vadd.f32 %v418_v15, %v288_v48  ;;  %v490_v31 = vadd.f32 %v489_v4, %v296_v50 }
 0x2c1   :  { %846 = vst [vmem:[#allocation2] sm:$0x1] %v417_v62  ;;  %848 = vst [vmem:[#allocation2 + $0x2] sm:$0x1] %v488_v63  ;;  %v316_v0 = vrot.slane %v278_v52, %v3263_v20  ;;  %v324_v62 = vrot.slane %v278_v52, %v3260_v19  ;;  %v3679_v63 = vld [vmem:[#allocation3 + $0x40] sm:$0xff]  ;;  %v320_v4 = vrot.slane %v278_v52, %v3269_v22 }
 0x2c2   :  { %847 = vst [vmem:[#allocation2 + $0x1] sm:$0x1] %v419_v27  ;;  %849 = vst [vmem:[#allocation2 + $0x3] sm:$0x1] %v490_v31  ;;  %v328_v13 = vrot.slane %v278_v52, %v3266_v21  ;;  %v332_v19 = vrot.slane %v278_v52, %v299_v9 }
 0x2c6   :  { %v558_v58 = vpop.f32.mrb[2].mxu0  ;;  %v629_v37 = vpop.f32.mrb[6].mxu1 }
 0x2c7   :  { %v559_v59 = vadd.f32 %v558_v58, %v300_v41  ;;  %v630_v47 = vadd.f32 %v629_v37, %v308_v42  ;;  %v560_v48 = vpop.f32.mrb[3].mxu0  ;;  %v631_v50 = vpop.f32.mrb[7].mxu1 }
 0x2c8   :  { %v561_v56 = vadd.f32 %v560_v48, %v304_v45  ;;  %v632_v15 = vadd.f32 %v631_v50, %v312_v46 }
 0x2c9   :  { %850 = vst [vmem:[#allocation2 + $0x8] sm:$0x1] %v559_v59  ;;  %852 = vst [vmem:[#allocation2 + $0xa] sm:$0x1] %v630_v47  ;;  %v1541_v11 = vld [vmem:[#allocation2] sm:$0xf] }
 0x2ca   :  { %851 = vst [vmem:[#allocation2 + $0x9] sm:$0x1] %v561_v56  ;;  %853 = vst [vmem:[#allocation2 + $0xb] sm:$0x1] %v632_v15  ;;  %1671 = vmatmul.mubr.f32.vlgmr.msra.gmra.mrb[10].mxu1 %v1541_v11  ;;  %1742 = vmatmul.mubr.f32.vlgmr.msra.gmra.mrb[8].mxu0 %v1541_v11 }
 0x2cb   :  { %2146 = vmatprep.mubr.f32.mxu1 %v3679_v63  ;;  %2217 = vmatprep.mubr.f32.mxu0 %v3679_v63 }
 0x2ce   :  { %v700_v27 = vpop.f32.mrb[4].mxu0  ;;  %v771_v31 = vpop.f32.mrb[8].mxu1 }
 0x2cf   :  { %v701_v36 = vadd.f32 %v700_v27, %v316_v0  ;;  %v772_v39 = vadd.f32 %v771_v31, %v324_v62  ;;  %v702_v41 = vpop.f32.mrb[5].mxu0  ;;  %v773_v42 = vpop.f32.mrb[9].mxu1 }
 0x2d0   :  { %v703_v45 = vadd.f32 %v702_v41, %v320_v4  ;;  %v774_v20 = vadd.f32 %v773_v42, %v328_v13  ;;  %v3144_v42 = vmov 0  }
 0x2d1   :  { %854 = vst [vmem:[#allocation2 + $0xc] sm:$0x1] %v701_v36  ;;  %856 = vst [vmem:[#allocation2 + $0xe] sm:$0x1] %v772_v39  ;;  %3015 = vset.pattern.permute.xlu0 %v3144_v42  ;;  %3016 = vset.pattern.permute.xlu1 %v3144_v42 }
 0x2d2   :  { %855 = vst [vmem:[#allocation2 + $0xd] sm:$0x1] %v703_v45  ;;  %857 = vst [vmem:[#allocation2 + $0xf] sm:$0x1] %v774_v20 }
 0x2d6   :  { %v842_v46 = vpop.f32.mrb[6].mxu0 }
 0x2d7   :  { %v843_v60 = vadd.f32 %v842_v46, %v332_v19  ;;  %v2744_v6 = vpop.f32.mrb[7].mxu0 }
 0x2d9   :  { %858 = vst [vmem:[#allocation2 + $0x10] sm:$0x1] %v843_v60 }
 0x2e0   :  { %v2436_v57 = vld [vmem:[#allocation2 + $0x10] sm:$0x1] }
 0x39d   :  { %v1672_v22 = vpop.f32.mrb[10].mxu1  ;;  %v1743_v21 = vpop.f32.mrb[8].mxu0 }
 0x39e   :  { %v1751_v58 = vsel %vm1750_vm0, %v1672_v22, 0.0  ;;  %v1761_v37 = vmul.f32 %v1672_v22, %v1672_v22  ;;  %v1674_v59 = vpop.f32.mrb[11].mxu1  ;;  %v1745_v47 = vpop.f32.mrb[9].mxu0  ;;  %v1763_v48 = vmul.f32 %v1743_v21, %v1743_v21  ;;  %v1754_v9 = vsel %vm1750_vm0, %v1743_v21, 0.0 }
 0x39f   :  { %v1752_v50 = vsel %vm1750_vm0, %v1674_v59, 0.0  ;;  %v1762_v56 = vmul.f32 %v1674_v59, %v1674_v59  ;;  %v1764_v0 = vmul.f32 %v1745_v47, %v1745_v47  ;;  %v1756_v13 = vsel %vm1750_vm0, %v1745_v47, 0.0 }
 0x3a0   :  { %v1765_v15 = vsel %vm1750_vm0, %v1761_v37, 0.0  ;;  %v1753_v11 = vadd.f32 %v1752_v50, %v1751_v58  ;;  %v1768_v27 = vsel %vm1750_vm0, %v1763_v48, 0.0  ;;  %v1748_v48 = vld [vmem:[%s4093_s5] sm:$0xf] }
 0x3a1   :  { %v1766_v52 = vsel %vm1750_vm0, %v1762_v56, 0.0  ;;  %v1770_v39 = vsel %vm1750_vm0, %v1764_v0, 0.0 }
 0x3a2   :  { %v1755_v62 = vadd.f32 %v1754_v9, %v1753_v11  ;;  %v1767_v4 = vadd.f32 %v1766_v52, %v1765_v15  ;;  %v1749_v15 = vld [vmem:[%s4093_s5 + $0x4] sm:$0xf] }
 0x3a4   :  { %v1757_v31 = vadd.f32 %v1756_v13, %v1755_v62  ;;  %v1769_v36 = vadd.f32 %v1768_v27, %v1767_v4 }
 0x3a6   :  { %1758 = vadd.xlane.f32.xlu0 %v1757_v31  ;;  %v1771_v41 = vadd.f32 %v1770_v39, %v1769_v36 }
 0x3a8   :  { %1772 = vadd.xlane.f32.xlu1 %v1771_v41 }
 0x433   :  { %v1759_v45 = vpop.xlane.xlu0 %1758 }
 0x434   :  { %v1760_v20 = vmul.f32 0.001953125, %v1759_v45 }
 0x435   :  { %v1773_v19 = vpop.xlane.xlu1 %1772 }
 0x436   :  { %v1775_v46 = vmul.f32 %v1760_v20, %v1760_v20  ;;  %v1774_v60 = vmul.f32 0.001953125, %v1773_v19 }
 0x438   :  { %v1776_v6 = vsub.f32 %v1774_v60, %v1775_v46 }
 0x43a   :  { %v1777_v58 = vmax.f32 %v1776_v6, 0.0 }
 0x43c   :  { %v1778_v37 = vadd.f32 1e-05, %v1777_v58 }
 0x43e   :  { %3017 = vrsqrt.f32 %v1778_v37 }
 0x448   :  { %v3018_v50 = vpop.eup %3017 }
 0x449   :  { %v1780_v56 = vmul.f32 %v3018_v50, %v1748_v48 }
 0x44b   :  { %1785 = vperm.xlu0 %3015, %v1780_v56   ;;  %v1781_v11 = vmul.f32 %v1780_v56, %v1760_v20 }
 0x44d   :  { %v1782_v9 = vsub.f32 %v1749_v15, %v1781_v11 }
 0x44f   :  { %1794 = vperm.xlu1 %3016, %v1782_v9  }
 0x4ca   :  { %v1786_v52 = vpop.permute.xlu0 %1785 }
 0x4cb   :  { %v1788_v0 = vmul.f32 %v1786_v52, %v1672_v22  ;;  %v1789_v62 = vmul.f32 %v1786_v52, %v1674_v59  ;;  %v1790_v4 = vmul.f32 %v1786_v52, %v1743_v21  ;;  %v1791_v13 = vmul.f32 %v1786_v52, %v1745_v47 }
 0x4ce   :  { %v1795_v27 = vpop.permute.xlu1 %1794 }
 0x4cf   :  { %v1797_v31 = vadd.f32 %v1795_v27, %v1788_v0  ;;  %v1798_v36 = vadd.f32 %v1795_v27, %v1789_v62  ;;  %v1799_v39 = vadd.f32 %v1795_v27, %v1790_v4  ;;  %v1800_v41 = vadd.f32 %v1795_v27, %v1791_v13 }
 0x4d1   :  { %v1801_v42 = vmax.f32 %v1797_v31, 0.0  ;;  %v1802_v45 = vmax.f32 %v1798_v36, 0.0  ;;  %v1803_v19 = vmax.f32 %v1799_v39, 0.0  ;;  %v1804_v46 = vmax.f32 %v1800_v41, 0.0 }
 0x4d3   :  { %1909 = vst [vmem:[#allocation3 + $0x40] sm:$0xf] %v1801_v42  ;;  %1910 = vst [vmem:[#allocation3 + $0x48] sm:$0xf] %v1802_v45  ;;  %1805 = vrot.lane.b32.xlu0 %v1801_v42, %s3135_s17  ;;  %1825 = vrot.lane.b32.xlu1 %v1801_v42, %s3136_s18 }
 0x4d4   :  { %1911 = vst [vmem:[#allocation3 + $0x50] sm:$0xf] %v1803_v19  ;;  %1912 = vst [vmem:[#allocation3 + $0x58] sm:$0xf] %v1804_v46 }
 0x4d7   :  { %1857 = vrot.lane.b32.xlu0 %v1801_v42, %s3137_s19  ;;  %1827 = vrot.lane.b32.xlu1 %v1802_v45, %s3136_s18 }
 0x4db   :  { %1811 = vrot.lane.b32.xlu0 %v1804_v46, %s3135_s17  ;;  %1877 = vrot.lane.b32.xlu1 %v1801_v42, %s3138_s20 }
 0x4df   :  { %1863 = vrot.lane.b32.xlu0 %v1804_v46, %s3137_s19  ;;  %1879 = vrot.lane.b32.xlu1 %v1802_v45, %s3138_s20 }
 0x4e3   :  { %1915 = vrot.lane.b32.xlu0 %v1802_v45, %s3139_s21  ;;  %1831 = vrot.lane.b32.xlu1 %v1804_v46, %s3136_s18 }
 0x4e7   :  { %1967 = vrot.lane.b32.xlu0 %v1802_v45, %s3141_s22  ;;  %1883 = vrot.lane.b32.xlu1 %v1804_v46, %s3138_s20 }
 0x4eb   :  { %1809 = vrot.lane.b32.xlu0 %v1803_v19, %s3135_s17  ;;  %1807 = vrot.lane.b32.xlu1 %v1802_v45, %s3135_s17 }
 0x4ef   :  { %1913 = vrot.lane.b32.xlu0 %v1801_v42, %s3139_s21  ;;  %1859 = vrot.lane.b32.xlu1 %v1802_v45, %s3137_s19 }
 0x4f3   :  { %1947 = vrot.lane.b32.xlu0 %v1802_v45, %s3140_s1  ;;  %1829 = vrot.lane.b32.xlu1 %v1803_v19, %s3136_s18 }
 0x4f7   :  { %1919 = vrot.lane.b32.xlu0 %v1804_v46, %s3139_s21  ;;  %1881 = vrot.lane.b32.xlu1 %v1803_v19, %s3138_s20 }
 0x4fb   :  { %1971 = vrot.lane.b32.xlu0 %v1804_v46, %s3141_s22  ;;  %1917 = vrot.lane.b32.xlu1 %v1803_v19, %s3139_s21 }
 0x4ff   :  { %1999 = vrot.lane.b32.xlu0 %v1802_v45, %s3142_s23  ;;  %1969 = vrot.lane.b32.xlu1 %v1803_v19, %s3141_s22 }
 0x503   :  { %1997 = vrot.lane.b32.xlu0 %v1801_v42, %s3142_s23  ;;  %1861 = vrot.lane.b32.xlu1 %v1803_v19, %s3137_s19 }
 0x507   :  { %1965 = vrot.lane.b32.xlu1 %v1801_v42, %s3141_s22 }
 0x50b   :  { %1949 = vrot.lane.b32.xlu1 %v1803_v19, %s3140_s1 }
 0x50f   :  { %1945 = vrot.lane.b32.xlu1 %v1801_v42, %s3140_s1 }
 0x513   :  { %1951 = vrot.lane.b32.xlu1 %v1804_v46, %s3140_s1 }
 0x517   :  { %2001 = vrot.lane.b32.xlu1 %v1803_v19, %s3142_s23 }
 0x51b   :  { %2003 = vrot.lane.b32.xlu1 %v1804_v46, %s3142_s23 }
 0x545   :  { %v1806_v22 = vpop.permute.xlu0 %1805  ;;  %v1826_v21 = vpop.permute.xlu1 %1825 }
 0x549   :  { %v1858_v59 = vpop.permute.xlu0 %1857  ;;  %v1828_v47 = vpop.permute.xlu1 %1827 }
 0x54a   :  { %v1835_v20 = vsel %vm1056_vm8, %v1826_v21, %v1828_v47 }
 0x54b   :  { %v1838_v60 = vmul.f32 %v1835_v20, %v3374_v24 }
 0x54d   :  { %v1846_v6 = vrot.slane %v1838_v60, 4  ;;  %v1812_v58 = vpop.permute.xlu0 %1811  ;;  %v1878_v37 = vpop.permute.xlu1 %1877 }
 0x54e   :  { %v1816_v48 = vsel %vm983_vm5, %v1812_v58, %v1806_v22 }
 0x54f   :  { %1854 = vst [vmem:[#allocation3 + $0x8] sm:$0xf0] %v1846_v6  ;;  %v1817_v50 = vmul.f32 %v1816_v48, %v3350_v5 }
 0x551   :  { %1821 = vst [vmem:[#allocation3] sm:$0xf] %v1817_v50  ;;  %v3737_v56 = vpop.permute.xlu0 %1863  ;;  %v1880_v15 = vpop.permute.xlu1 %1879 }
 0x552   :  { %v1868_v11 = vsel %vm1126_vm11, %v3737_v56, %v1858_v59  ;;  %v1887_v9 = vsel %vm1196_vm12, %v1878_v37, %v1880_v15 }
 0x553   :  { %v1869_v52 = vmul.f32 %v1868_v11, %v3412_v51  ;;  %v1890_v0 = vmul.f32 %v1887_v9, %v3442_v25 }
 0x555   :  { %1873 = vst [vmem:[#allocation3 + $0x20] sm:$0xf] %v1869_v52  ;;  %v1898_v62 = vrot.slane %v1890_v0, 4  ;;  %v3746_v4 = vpop.permute.xlu0 %1915  ;;  %v1832_v13 = vpop.permute.xlu1 %1831 }
 0x556   :  { %v1836_v27 = vsel %vm1056_vm8, %v1832_v13, %v1826_v21 }
 0x557   :  { %1906 = vst [vmem:[#allocation3 + $0x28] sm:$0xf0] %v1898_v62  ;;  %v1837_v31 = vmul.f32 %v1836_v27, %v3379_v26 }
 0x559   :  { %v1845_v36 = vrot.slane %v1837_v31, 4  ;;  %v3751_v39 = vpop.permute.xlu0 %1967  ;;  %v1884_v41 = vpop.permute.xlu1 %1883 }
 0x55a   :  { %v1888_v42 = vsel %vm1196_vm12, %v1884_v41, %v1878_v37 }
 0x55b   :  { %1853 = vst [vmem:[#allocation3] sm:$0xf0] %v1845_v36  ;;  %v1889_v45 = vmul.f32 %v1888_v42, %v3447_v28 }
 0x55d   :  { %v1897_v19 = vrot.slane %v1889_v45, 4  ;;  %v1810_v46 = vpop.permute.xlu0 %1809  ;;  %v1808_v20 = vpop.permute.xlu1 %1807 }
 0x55e   :  { %v1813_v60 = vsel %vm983_vm5, %v1810_v46, %v1812_v58  ;;  %v1814_v21 = vsel %vm983_vm5, %v1808_v20, %v1810_v46  ;;  %v1815_v6 = vsel %vm983_vm5, %v1806_v22, %v1808_v20 }
 0x55f   :  { %1905 = vst [vmem:[#allocation3 + $0x20] sm:$0xf0] %v1897_v19  ;;  %v1820_v48 = vmul.f32 %v1813_v60, %v3353_v7  ;;  %v1818_v37 = vmul.f32 %v1815_v6, %v3360_v10  ;;  %v1819_v50 = vmul.f32 %v1814_v21, %v3363_v12 }
 0x561   :  { %1824 = vst [vmem:[#allocation3 + $0x18] sm:$0xf] %v1820_v48  ;;  %1822 = vst [vmem:[#allocation3 + $0x8] sm:$0xf] %v1818_v37  ;;  %v1914_v11 = vpop.permute.xlu0 %1913  ;;  %v3765_v9 = vpop.permute.xlu1 %1859 }
 0x562   :  { %1823 = vst [vmem:[#allocation3 + $0x10] sm:$0xf] %v1819_v50  ;;  %v1923_v58 = vsel %vm1269_vm13, %v1914_v11, %v3746_v4  ;;  %v1867_v22 = vsel %vm1126_vm11, %v1858_v59, %v3765_v9 }
 0x563   :  { %v1925_v52 = vmul.f32 %v1923_v58, %v3476_v53  ;;  %v1870_v0 = vmul.f32 %v1867_v22, %v3407_v49 }
 0x565   :  { %v1933_v62 = vrot.slane %v1925_v52, 4  ;;  %1874 = vst [vmem:[#allocation3 + $0x28] sm:$0xf] %v1870_v0  ;;  %v3775_v27 = vpop.permute.xlu0 %1947  ;;  %v1830_v31 = vpop.permute.xlu1 %1829 }
 0x566   :  { %v1833_v36 = vsel %vm1056_vm8, %v1830_v31, %v1832_v13  ;;  %v1834_v42 = vsel %vm1056_vm8, %v1828_v47, %v1830_v31  ;;  %v2022_v50 = vld [vmem:[#allocation3 + $0x20] sm:$0xff] }
 0x567   :  { %1941 = vst [vmem:[#allocation3 + $0x40] sm:$0xf0] %v1933_v62  ;;  %v1839_v45 = vmul.f32 %v1834_v42, %v3382_v29  ;;  %v1840_v59 = vmul.f32 %v1833_v36, %v3385_v30  ;;  %v2018_v36 = vld [vmem:[#allocation3] sm:$0xff] }
 0x568   :  { %v2019_v58 = vld [vmem:[#allocation3 + $0x8] sm:$0xff] }
 0x569   :  { %v1847_v19 = vrot.slane %v1839_v45, 4  ;;  %v1848_v46 = vrot.slane %v1840_v59, 4  ;;  %v1920_v20 = vpop.permute.xlu0 %1919  ;;  %v1882_v60 = vpop.permute.xlu1 %1881  ;;  %v2868_v45 = vpack.c.bf16 %v2022_v50, %v2018_v36 }
 0x56a   :  { %v1924_v21 = vsel %vm1269_vm13, %v1920_v20, %v1914_v11  ;;  %v1885_v6 = vsel %vm1196_vm12, %v1882_v60, %v1884_v41  ;;  %v1886_v13 = vsel %vm1196_vm12, %v1880_v15, %v1882_v60 }
 0x56b   :  { %1855 = vst [vmem:[#allocation3 + $0x10] sm:$0xf0] %v1847_v19  ;;  %1856 = vst [vmem:[#allocation3 + $0x18] sm:$0xf0] %v1848_v46  ;;  %v1928_v47 = vmul.f32 %v1924_v21, %v3481_v61  ;;  %v1891_v48 = vmul.f32 %v1886_v13, %v3452_v33  ;;  %v1892_v37 = vmul.f32 %v1885_v6, %v3455_v34 }
 0x56c   :  { %v2023_v22 = vld [vmem:[#allocation3 + $0x28] sm:$0xff] }
 0x56d   :  { %v1936_v52 = vrot.slane %v1928_v47, 4  ;;  %v1899_v0 = vrot.slane %v1891_v48, 4  ;;  %v1900_v11 = vrot.slane %v1892_v37, 4  ;;  %v1972_v62 = vpop.permute.xlu0 %1971  ;;  %v1918_v31 = vpop.permute.xlu1 %1917  ;;  %v2866_v41 = vpack.c.bf16 %v2023_v22, %v2019_v58 }
 0x56e   :  { %v1921_v15 = vsel %vm1269_vm13, %v1918_v31, %v1920_v20  ;;  %v1922_v42 = vsel %vm1269_vm13, %v3746_v4, %v1918_v31 }
 0x56f   :  { %1944 = vst [vmem:[#allocation3 + $0x58] sm:$0xf0] %v1936_v52  ;;  %1907 = vst [vmem:[#allocation3 + $0x30] sm:$0xf0] %v1899_v0  ;;  %v1926_v59 = vmul.f32 %v1922_v42, %v3486_v1  ;;  %v1927_v19 = vmul.f32 %v1921_v15, %v3489_v2  ;;  %2867 = vmatprep.subr.bf16.mxu1 %v2866_v41 }
 0x570   :  { %1908 = vst [vmem:[#allocation3 + $0x38] sm:$0xf0] %v1900_v11  ;;  %2869 = vmatpush1.bf16.msra.mxu1 %v2868_v45 }
 0x571   :  { %v1934_v46 = vrot.slane %v1926_v59, 4  ;;  %v1935_v60 = vrot.slane %v1927_v19, 4  ;;  %v2000_v21 = vpop.permute.xlu0 %1999  ;;  %v1970_v6 = vpop.permute.xlu1 %1969 }
 0x572   :  { %v1973_v20 = vsel %vm1409_vm2, %v1970_v6, %v1972_v62  ;;  %v1974_v4 = vsel %vm1409_vm2, %v3751_v39, %v1970_v6  ;;  %v2021_v6 = vld [vmem:[#allocation3 + $0x18] sm:$0xff] }
 0x573   :  { %1942 = vst [vmem:[#allocation3 + $0x48] sm:$0xf0] %v1934_v46  ;;  %1943 = vst [vmem:[#allocation3 + $0x50] sm:$0xf0] %v1935_v60  ;;  %v1978_v13 = vmul.f32 %v1974_v4, %v3554_v32  ;;  %v1979_v47 = vmul.f32 %v1973_v20, %v3557_v35  ;;  %v2020_v20 = vld [vmem:[#allocation3 + $0x10] sm:$0xff] }
 0x575   :  { %v1986_v48 = vrot.slane %v1978_v13, 4  ;;  %v1987_v37 = vrot.slane %v1979_v47, 4  ;;  %v1998_v50 = vpop.permute.xlu0 %1997  ;;  %v1862_v58 = vpop.permute.xlu1 %1861 }
 0x576   :  { %v2007_v22 = vsel %vm1479_vm6, %v1998_v50, %v2000_v21  ;;  %v1865_v52 = vsel %vm1126_vm11, %v1862_v58, %v3737_v56  ;;  %v1866_v0 = vsel %vm1126_vm11, %v3765_v9, %v1862_v58 }
 0x577   :  { %1994 = vst [vmem:[#allocation3 + $0x68] sm:$0xf0] %v1986_v48  ;;  %1995 = vst [vmem:[#allocation3 + $0x70] sm:$0xf0] %v1987_v37  ;;  %v2009_v11 = vmul.f32 %v2007_v22, %v3579_v3  ;;  %v1871_v31 = vmul.f32 %v1866_v0, %v3419_v54  ;;  %v1872_v41 = vmul.f32 %v1865_v52, %v3422_v55 }
 0x579   :  { %2013 = vst [vmem:[#allocation3 + $0x80] sm:$0xf] %v2009_v11  ;;  %1875 = vst [vmem:[#allocation3 + $0x30] sm:$0xf] %v1871_v31  ;;  %v1966_v36 = vpop.permute.xlu1 %1965 }
 0x57a   :  { %1876 = vst [vmem:[#allocation3 + $0x38] sm:$0xf] %v1872_v41  ;;  %v1975_v56 = vsel %vm1409_vm2, %v1966_v36, %v3751_v39  ;;  %v1976_v15 = vsel %vm1409_vm2, %v1972_v62, %v1966_v36  ;;  %v2027_v31 = vld [vmem:[#allocation3 + $0x48] sm:$0xff] }
 0x57b   :  { %v1977_v9 = vmul.f32 %v1975_v56, %v3544_v17  ;;  %v1980_v42 = vmul.f32 %v1976_v15, %v3549_v23 }
 0x57d   :  { %v1985_v45 = vrot.slane %v1977_v9, 4  ;;  %v1988_v59 = vrot.slane %v1980_v42, 4  ;;  %v1950_v19 = vpop.permute.xlu1 %1949  ;;  %v2026_v9 = vld [vmem:[#allocation3 + $0x40] sm:$0xff] }
 0x57e   :  { %v1954_v46 = vsel %vm1339_vm1, %v3775_v27, %v1950_v19 }
 0x57f   :  { %1993 = vst [vmem:[#allocation3 + $0x60] sm:$0xf0] %v1985_v45  ;;  %1996 = vst [vmem:[#allocation3 + $0x78] sm:$0xf0] %v1988_v59  ;;  %v1958_v60 = vmul.f32 %v1954_v46, %v3521_v43 }
 0x580   :  { %v2024_v4 = vld [vmem:[#allocation3 + $0x30] sm:$0xff] }
 0x581   :  { %v2025_v39 = vld [vmem:[#allocation3 + $0x38] sm:$0xff]  ;;  %1962 = vst [vmem:[#allocation3 + $0x68] sm:$0xf] %v1958_v60  ;;  %v1946_v62 = vpop.permute.xlu1 %1945  ;;  %v2900_v47 = vpack.c.bf16 %v2024_v4, %v2020_v20  ;;  %v2028_v20 = vld [vmem:[#allocation3 + $0x50] sm:$0xff] }
 0x582   :  { %v2898_v13 = vpack.c.bf16 %v2025_v39, %v2021_v6  ;;  %v1955_v48 = vsel %vm1339_vm1, %v1946_v62, %v3775_v27 }
 0x583   :  { %v1957_v37 = vmul.f32 %v1955_v48, %v3511_v38 }
 0x584   :  { %2899 = vmatprep.subr.bf16.mxu0 %v2898_v13 }
 0x585   :  { %2901 = vmatpush1.bf16.msra.mxu0 %v2900_v47  ;;  %1961 = vst [vmem:[#allocation3 + $0x60] sm:$0xf] %v1957_v37  ;;  %v1952_v58 = vpop.permute.xlu1 %1951  ;;  %v2034_v47 = vld [vmem:[#allocation3 + $0x80] sm:$0xff] }
 0x586   :  { %v1953_v22 = vsel %vm1339_vm1, %v1950_v19, %v1952_v58  ;;  %v1956_v52 = vsel %vm1339_vm1, %v1952_v58, %v1946_v62 }
 0x587   :  { %v1959_v0 = vmul.f32 %v1953_v22, %v3524_v44  ;;  %v1960_v11 = vmul.f32 %v1956_v52, %v3516_v40 }
 0x588   :  { %v2031_v41 = vld [vmem:[#allocation3 + $0x68] sm:$0xff] }
 0x589   :  { %1963 = vst [vmem:[#allocation3 + $0x70] sm:$0xf] %v1959_v0  ;;  %1964 = vst [vmem:[#allocation3 + $0x78] sm:$0xf] %v1960_v11  ;;  %v2002_v27 = vpop.permute.xlu1 %2001  ;;  %v2870_v36 = vpack.c.bf16 %v2031_v41, %v2027_v31  ;;  %v3863_v11 = vpack.c.bf16 %v3679_v63, %v3679_v63  ;;  %v2017_v31 = vld [vmem:[#allocation2 + $0x8] sm:$0xff] }
 0x58a   :  { %v2006_v56 = vsel %vm1479_vm6, %v2000_v21, %v2002_v27  ;;  %v2029_v21 = vld [vmem:[#allocation3 + $0x58] sm:$0xff] }
 0x58b   :  { %v2010_v15 = vmul.f32 %v2006_v56, %v3589_v14  ;;  %2871 = vmatprep.subr.bf16.mxu1 %v2870_v36 }
 0x58c   :  { %v2030_v42 = vld [vmem:[#allocation3 + $0x60] sm:$0xff] }
 0x58d   :  { %2014 = vst [vmem:[#allocation3 + $0x88] sm:$0xf] %v2010_v15  ;;  %v2004_v45 = vpop.permute.xlu1 %2003  ;;  %v2872_v59 = vpack.c.bf16 %v2030_v42, %v2026_v9 }
 0x58e   :  { %v2005_v19 = vsel %vm1479_vm6, %v2002_v27, %v2004_v45  ;;  %v2008_v46 = vsel %vm1479_vm6, %v2004_v45, %v1998_v50  ;;  %v2876_v50 = vpack.c.bf16 %v3679_v63, %v2034_v47 }
 0x58f   :  { %v2011_v60 = vmul.f32 %v2005_v19, %v3592_v16  ;;  %v2012_v6 = vmul.f32 %v2008_v46, %v3584_v8  ;;  %2873 = vmatpush1.bf16.msra.mxu1 %v2872_v59 }
 0x590   :  { %v2033_v39 = vld [vmem:[#allocation3 + $0x78] sm:$0xff]  ;;  %v2032_v4 = vld [vmem:[#allocation3 + $0x70] sm:$0xff] }
 0x591   :  { %2015 = vst [vmem:[#allocation3 + $0x90] sm:$0xf] %v2011_v60  ;;  %2016 = vst [vmem:[#allocation3 + $0x98] sm:$0xf] %v2012_v6  ;;  %v2902_v62 = vpack.c.bf16 %v2033_v39, %v2029_v21  ;;  %v2904_v13 = vpack.c.bf16 %v2032_v4, %v2028_v20 }
 0x593   :  { %2903 = vmatprep.subr.bf16.mxu0 %v2902_v62 }
 0x594   :  { %2905 = vmatpush1.bf16.msra.mxu0 %v2904_v13  ;;  %v2035_v48 = vld [vmem:[#allocation3 + $0x88] sm:$0xff] }
 0x595   :  { %v2874_v37 = vpack.c.bf16 %v3679_v63, %v2035_v48  ;;  %v2224_v48 = vld [vmem:[%s4093_s5 + $0x8] sm:$0xff] }
 0x597   :  { %2875 = vmatprep.subr.bf16.mxu1 %v2874_v37 }
 0x598   :  { %2877 = vmatpush1.bf16.msra.mxu1 %v2876_v50  ;;  %v2037_v58 = vld [vmem:[#allocation3 + $0x98] sm:$0xff]  ;;  %v2036_v22 = vld [vmem:[#allocation3 + $0x90] sm:$0xff] }
 0x599   :  { %2879 = vmatprep.subr.bf16.mxu1 %v4107_v18  ;;  %v2906_v52 = vpack.c.bf16 %v3679_v63, %v2037_v58  ;;  %v2908_v0 = vpack.c.bf16 %v3679_v63, %v2036_v22  ;;  %v2225_v58 = vld [vmem:[%s4093_s5 + $0x10] sm:$0xff]  ;;  %s3145_s5 = smov [#allocation10]  }
 0x59a   :  { %s2683_s11 = sshll.u32 %s3145_s5, 4  ;;  %s2684_s11 = int_to_ptr.vmem [resolvable:$true] %s2683_s11 }
 0x59b   :  { %2907 = vmatprep.subr.bf16.mxu0 %v2906_v52  ;;  %s3097_s3 = scalar_lea.vmem %s2684_s11, 64  ;;  %p3102_p11 = scmp.lt.s32.totalorder %s2684_s11, %s2684_s11 }
 0x59c   :  { %2881 = vmatpush1.bf16.msra.mxu1 %v4107_v18  ;;  %2909 = vmatpush1.bf16.msra.mxu0 %v2908_v0  ;;  %p3098_p10 = scmp.ne.s32.totalorder %s2684_s11, %s3097_s3  ;;  %p3103_p12 = scmp.lt.s32.totalorder %s3097_s3, %s3097_s3 }
 0x59d   :  { %2883 = vmatprep.subr.bf16.mxu1 %v4107_v18  ;;  %2911 = vmatprep.subr.bf16.mxu0 %v4107_v18 }
 0x59e   :  { %p3104_p13 = por %p3103_p12, %p3102_p11 }
 0x5a0   :  { %2885 = vmatpush1.bf16.msra.mxu1 %v4107_v18  ;;  %2913 = vmatpush1.bf16.msra.mxu0 %v4107_v18  ;;  %p3105_p0 = pnand %p3104_p13, %p3098_p10 }
 0x5a1   :  { %2887 = vmatprep.subr.bf16.mxu1 %v4107_v18  ;;  %2915 = vmatprep.subr.bf16.mxu0 %v4107_v18 }
 0x5a4   :  { %2889 = vmatpush1.bf16.msra.mxu1 %v4107_v18  ;;  %2917 = vmatpush1.bf16.msra.mxu0 %v4107_v18 }
 0x5a5   :  { %2891 = vmatprep.subr.bf16.mxu1 %v4107_v18  ;;  %2919 = vmatprep.subr.bf16.mxu0 %v4107_v18 }
 0x5a8   :  { %2893 = vmatpush1.bf16.msra.mxu1 %v3863_v11  ;;  %2921 = vmatpush1.bf16.msra.mxu0 %v3863_v11 }
 0x5a9   :  { %2895 = vmatprep.subr.bf16.mxu1 %v3863_v11  ;;  %2923 = vmatprep.subr.bf16.mxu0 %v3863_v11 }
 0x5ac   :  { %2897 = vmatpush1.bf16.msra.mxu1 %v3863_v11  ;;  %2925 = vmatpush1.bf16.msra.mxu0 %v3863_v11 }
 0x5ad   :  { %2927 = vmatprep.subr.bf16.mxu0 %v3863_v11 }
 0x5af   :  { %2147 = vmatmul.mubr.f32.vlgmr.msra.gmra.mrb[12].mxu1 %v2017_v31 }
 0x5b0   :  { %2929 = vmatpush1.bf16.msra.mxu0 %v3863_v11  ;;  %2565 = vmatprep.mubr.f32.mxu1 %v3679_v63 }
 0x5b3   :  { %2218 = vmatmul.mubr.f32.vlgmr.msra.gmra.mrb[10].mxu0 %v2017_v31 }
 0x5b4   :  { %2636 = vmatprep.mubr.f32.mxu0 %v3679_v63 }
 0x682   :  { %v2148_v18 = vpop.f32.mrb[12].mxu1 }
 0x683   :  { %v2232_v41 = vmul.f32 %v2148_v18, %v2148_v18  ;;  %v2150_v27 = vpop.f32.mrb[13].mxu1 }
 0x684   :  { %v2226_v36 = vadd.f32 %v2150_v27, %v2148_v18  ;;  %v2233_v56 = vmul.f32 %v2150_v27, %v2150_v27 }
 0x686   :  { %v2219_v15 = vpop.f32.mrb[10].mxu0  ;;  %v2236_v9 = vadd.f32 %v2233_v56, %v2232_v41 }
 0x687   :  { %v2234_v42 = vmul.f32 %v2219_v15, %v2219_v15  ;;  %v2221_v45 = vpop.f32.mrb[11].mxu0  ;;  %v2227_v59 = vadd.f32 %v2226_v36, %v2219_v15 }
 0x688   :  { %v2235_v19 = vmul.f32 %v2221_v45, %v2221_v45 }
 0x689   :  { %v2228_v46 = vadd.f32 %v2227_v59, %v2221_v45  ;;  %v2237_v60 = vadd.f32 %v2236_v9, %v2234_v42 }
 0x68b   :  { %2229 = vadd.xlane.f32.xlu0 %v2228_v46  ;;  %v2238_v6 = vadd.f32 %v2237_v60, %v2235_v19 }
 0x68d   :  { %2239 = vadd.xlane.f32.xlu1 %v2238_v6 }
 0x718   :  { %v2230_v21 = vpop.xlane.xlu0 %2229 }
 0x719   :  { %v2231_v39 = vmul.f32 0.001953125, %v2230_v21 }
 0x71a   :  { %v2240_v20 = vpop.xlane.xlu1 %2239 }
 0x71b   :  { %v2242_v63 = vmul.f32 %v2231_v39, %v2231_v39  ;;  %v2241_v4 = vmul.f32 0.001953125, %v2240_v20 }
 0x71d   :  { %v2243_v62 = vsub.f32 %v2241_v4, %v2242_v63 }
 0x71f   :  { %v2244_v13 = vmax.f32 %v2243_v62, 0.0 }
 0x721   :  { %v2245_v47 = vadd.f32 1e-05, %v2244_v13 }
 0x723   :  { %3019 = vrsqrt.f32 %v2245_v47 }
 0x72d   :  { %v3020_v37 = vpop.eup %3019 }
 0x72e   :  { %v2247_v50 = vmul.f32 %v3020_v37, %v2224_v48 }
 0x730   :  { %2252 = vperm.xlu0 %3015, %v2247_v50   ;;  %v2248_v22 = vmul.f32 %v2247_v50, %v2231_v39 }
 0x732   :  { %v2249_v52 = vsub.f32 %v2225_v58, %v2248_v22 }
 0x734   :  { %2261 = vperm.xlu1 %3016, %v2249_v52  }
 0x7af   :  { %v2253_v0 = vpop.permute.xlu0 %2252 }
 0x7b0   :  { %v2255_v31 = vmul.f32 %v2253_v0, %v2148_v18  ;;  %v2256_v41 = vmul.f32 %v2253_v0, %v2150_v27  ;;  %v2257_v36 = vmul.f32 %v2253_v0, %v2219_v15  ;;  %v2258_v56 = vmul.f32 %v2253_v0, %v2221_v45 }
 0x7b3   :  { %v2262_v9 = vpop.permute.xlu1 %2261 }
 0x7b4   :  { %v2264_v42 = vadd.f32 %v2262_v9, %v2255_v31  ;;  %v2265_v59 = vadd.f32 %v2262_v9, %v2256_v41  ;;  %v2266_v19 = vadd.f32 %v2262_v9, %v2257_v36  ;;  %v2267_v46 = vadd.f32 %v2262_v9, %v2258_v56 }
 0x7b6   :  { %v3883_v60 = vmax.f32 %v2264_v42, 0.0  ;;  %v3885_v6 = vmax.f32 %v2265_v59, 0.0  ;;  %v3887_v21 = vmax.f32 %v2266_v19, 0.0  ;;  %v3889_v20 = vmax.f32 %v2267_v46, 0.0 }
 0x7b8   :  { %2352 = vst [vmem:[#allocation3 + $0x80] sm:$0xff] %v3883_v60  ;;  %2353 = vst [vmem:[#allocation3 + $0x88] sm:$0xff] %v3885_v6  ;;  %2274 = vrot.lane.b32.xlu1 %v3885_v6, %s3135_s17  ;;  %2272 = vrot.lane.b32.xlu0 %v3883_v60, %s3135_s17 }
 0x7b9   :  { %2354 = vst [vmem:[#allocation3 + $0x90] sm:$0xff] %v3887_v21  ;;  %2355 = vst [vmem:[#allocation3 + $0x98] sm:$0xff] %v3889_v20 }
 0x7bc   :  { %2278 = vrot.lane.b32.xlu1 %v3889_v20, %s3135_s17  ;;  %2276 = vrot.lane.b32.xlu0 %v3887_v21, %s3135_s17 }
 0x7c0   :  { %2294 = vrot.lane.b32.xlu1 %v3885_v6, %s3136_s18  ;;  %2292 = vrot.lane.b32.xlu0 %v3883_v60, %s3136_s18 }
 0x7c4   :  { %2298 = vrot.lane.b32.xlu1 %v3889_v20, %s3136_s18  ;;  %2296 = vrot.lane.b32.xlu0 %v3887_v21, %s3136_s18 }
 0x7c8   :  { %2314 = vrot.lane.b32.xlu1 %v3885_v6, %s3137_s19  ;;  %2312 = vrot.lane.b32.xlu0 %v3883_v60, %s3137_s19 }
 0x7cc   :  { %2318 = vrot.lane.b32.xlu1 %v3889_v20, %s3137_s19  ;;  %2316 = vrot.lane.b32.xlu0 %v3887_v21, %s3137_s19 }
 0x7d0   :  { %2334 = vrot.lane.b32.xlu1 %v3885_v6, %s3138_s20  ;;  %2332 = vrot.lane.b32.xlu0 %v3883_v60, %s3138_s20 }
 0x7d4   :  { %2338 = vrot.lane.b32.xlu1 %v3889_v20, %s3138_s20  ;;  %2336 = vrot.lane.b32.xlu0 %v3887_v21, %s3138_s20 }
 0x7d8   :  { %2358 = vrot.lane.b32.xlu1 %v3885_v6, %s3139_s21  ;;  %2356 = vrot.lane.b32.xlu0 %v3883_v60, %s3139_s21 }
 0x7dc   :  { %2362 = vrot.lane.b32.xlu1 %v3889_v20, %s3139_s21  ;;  %2360 = vrot.lane.b32.xlu0 %v3887_v21, %s3139_s21 }
 0x7e0   :  { %2378 = vrot.lane.b32.xlu1 %v3885_v6, %s3140_s1  ;;  %2376 = vrot.lane.b32.xlu0 %v3883_v60, %s3140_s1 }
 0x7e4   :  { %2382 = vrot.lane.b32.xlu1 %v3889_v20, %s3140_s1  ;;  %2380 = vrot.lane.b32.xlu0 %v3887_v21, %s3140_s1 }
 0x7e8   :  { %2398 = vrot.lane.b32.xlu1 %v3885_v6, %s3141_s22  ;;  %2396 = vrot.lane.b32.xlu0 %v3883_v60, %s3141_s22 }
 0x7ec   :  { %2402 = vrot.lane.b32.xlu1 %v3889_v20, %s3141_s22  ;;  %2400 = vrot.lane.b32.xlu0 %v3887_v21, %s3141_s22 }
 0x7f0   :  { %2418 = vrot.lane.b32.xlu1 %v3885_v6, %s3142_s23  ;;  %2416 = vrot.lane.b32.xlu0 %v3883_v60, %s3142_s23 }
 0x7f4   :  { %2422 = vrot.lane.b32.xlu1 %v3889_v20, %s3142_s23  ;;  %2420 = vrot.lane.b32.xlu0 %v3887_v21, %s3142_s23 }
 0x82a   :  { %v2275_v18 = vpop.permute.xlu1 %2274  ;;  %v2273_v27 = vpop.permute.xlu0 %2272 }
 0x82b   :  { %v2282_v15 = vsel %vm983_vm5, %v2273_v27, %v2275_v18 }
 0x82c   :  { %v2285_v45 = vmul.f32 %v2282_v15, %v3360_v10 }
 0x82e   :  { %2289 = vst [vmem:[#allocation3 + $0x8] sm:$0xff] %v2285_v45  ;;  %v2279_v39 = vpop.permute.xlu1 %2278  ;;  %v2277_v63 = vpop.permute.xlu0 %2276 }
 0x82f   :  { %v2283_v4 = vsel %vm983_vm5, %v2279_v39, %v2273_v27  ;;  %v2280_v62 = vsel %vm983_vm5, %v2277_v63, %v2279_v39  ;;  %v2281_v13 = vsel %vm983_vm5, %v2275_v18, %v2277_v63 }
 0x830   :  { %v2284_v47 = vmul.f32 %v2283_v4, %v3350_v5  ;;  %v2286_v48 = vmul.f32 %v2281_v13, %v3363_v12  ;;  %v2287_v37 = vmul.f32 %v2280_v62, %v3353_v7 }
 0x832   :  { %2288 = vst [vmem:[#allocation3] sm:$0xff] %v2284_v47  ;;  %2290 = vst [vmem:[#allocation3 + $0x10] sm:$0xff] %v2286_v48  ;;  %v2295_v10 = vpop.permute.xlu1 %2294  ;;  %v2293_v50 = vpop.permute.xlu0 %2292 }
 0x833   :  { %2291 = vst [vmem:[#allocation3 + $0x18] sm:$0xff] %v2287_v37  ;;  %v2302_v58 = vsel %vm1056_vm8, %v2293_v50, %v2295_v10 }
 0x834   :  { %v2305_v22 = vmul.f32 %v2302_v58, %v3374_v24 }
 0x836   :  { %2309 = vst [vmem:[#allocation3 + $0x28] sm:$0xff] %v2305_v22  ;;  %v2299_v52 = vpop.permute.xlu1 %2298  ;;  %v2297_v0 = vpop.permute.xlu0 %2296  ;;  %v2930_v31 = vpack.c.bf16 %v2305_v22, %v2285_v45 }
 0x837   :  { %v2303_v5 = vsel %vm1056_vm8, %v2299_v52, %v2293_v50  ;;  %v2300_v7 = vsel %vm1056_vm8, %v2297_v0, %v2299_v52  ;;  %v2301_v12 = vsel %vm1056_vm8, %v2295_v10, %v2297_v0 }
 0x838   :  { %v2304_v41 = vmul.f32 %v2303_v5, %v3379_v26  ;;  %v2306_v36 = vmul.f32 %v2301_v12, %v3382_v29  ;;  %v2307_v56 = vmul.f32 %v2300_v7, %v3385_v30  ;;  %2931 = vmatprep.subr.bf16.mxu1 %v2930_v31 }
 0x83a   :  { %2308 = vst [vmem:[#allocation3 + $0x20] sm:$0xff] %v2304_v41  ;;  %2310 = vst [vmem:[#allocation3 + $0x30] sm:$0xff] %v2306_v36  ;;  %v2315_v24 = vpop.permute.xlu1 %2314  ;;  %v2313_v9 = vpop.permute.xlu0 %2312  ;;  %v2932_v42 = vpack.c.bf16 %v2304_v41, %v2284_v47  ;;  %v2962_v59 = vpack.c.bf16 %v2307_v56, %v2287_v37  ;;  %v2964_v19 = vpack.c.bf16 %v2306_v36, %v2286_v48 }
 0x83b   :  { %2311 = vst [vmem:[#allocation3 + $0x38] sm:$0xff] %v2307_v56  ;;  %v2322_v46 = vsel %vm1126_vm11, %v2313_v9, %v2315_v24 }
 0x83c   :  { %v2325_v18 = vmul.f32 %v2322_v46, %v3407_v49  ;;  %2933 = vmatpush1.bf16.msra.mxu1 %v2932_v42  ;;  %2963 = vmatprep.subr.bf16.mxu0 %v2962_v59 }
 0x83d   :  { %2965 = vmatpush1.bf16.msra.mxu0 %v2964_v19 }
 0x83e   :  { %2329 = vst [vmem:[#allocation3 + $0x48] sm:$0xff] %v2325_v18  ;;  %v2319_v26 = vpop.permute.xlu1 %2318  ;;  %v2317_v29 = vpop.permute.xlu0 %2316 }
 0x83f   :  { %v2323_v30 = vsel %vm1126_vm11, %v2319_v26, %v2313_v9  ;;  %v2320_v27 = vsel %vm1126_vm11, %v2317_v29, %v2319_v26  ;;  %v2321_v15 = vsel %vm1126_vm11, %v2315_v24, %v2317_v29 }
 0x840   :  { %v2324_v45 = vmul.f32 %v2323_v30, %v3412_v51  ;;  %v2326_v39 = vmul.f32 %v2321_v15, %v3419_v54  ;;  %v2327_v49 = vmul.f32 %v2320_v27, %v3422_v55 }
 0x842   :  { %2328 = vst [vmem:[#allocation3 + $0x40] sm:$0xff] %v2324_v45  ;;  %2330 = vst [vmem:[#allocation3 + $0x50] sm:$0xff] %v2326_v39  ;;  %v2335_v63 = vpop.permute.xlu1 %2334  ;;  %v2333_v4 = vpop.permute.xlu0 %2332 }
 0x843   :  { %2331 = vst [vmem:[#allocation3 + $0x58] sm:$0xff] %v2327_v49  ;;  %v2342_v62 = vsel %vm1196_vm12, %v2333_v4, %v2335_v63 }
 0x844   :  { %v2345_v13 = vmul.f32 %v2342_v62, %v3442_v25 }
 0x846   :  { %2349 = vst [vmem:[#allocation3 + $0x68] sm:$0xff] %v2345_v13  ;;  %v2339_v47 = vpop.permute.xlu1 %2338  ;;  %v2337_v48 = vpop.permute.xlu0 %2336  ;;  %v2934_v37 = vpack.c.bf16 %v2345_v13, %v2325_v18 }
 0x847   :  { %v2343_v51 = vsel %vm1196_vm12, %v2339_v47, %v2333_v4  ;;  %v2340_v54 = vsel %vm1196_vm12, %v2337_v48, %v2339_v47  ;;  %v2341_v55 = vsel %vm1196_vm12, %v2335_v63, %v2337_v48 }
 0x848   :  { %v2344_v10 = vmul.f32 %v2343_v51, %v3447_v28  ;;  %v2346_v50 = vmul.f32 %v2341_v55, %v3452_v33  ;;  %v2347_v58 = vmul.f32 %v2340_v54, %v3455_v34  ;;  %2935 = vmatprep.subr.bf16.mxu1 %v2934_v37 }
 0x84a   :  { %2348 = vst [vmem:[#allocation3 + $0x60] sm:$0xff] %v2344_v10  ;;  %2350 = vst [vmem:[#allocation3 + $0x70] sm:$0xff] %v2346_v50  ;;  %v2359_v25 = vpop.permute.xlu1 %2358  ;;  %v2357_v22 = vpop.permute.xlu0 %2356  ;;  %v2936_v52 = vpack.c.bf16 %v2344_v10, %v2324_v45  ;;  %v2966_v0 = vpack.c.bf16 %v2347_v58, %v2327_v49  ;;  %v2968_v31 = vpack.c.bf16 %v2346_v50, %v2326_v39 }
 0x84b   :  { %2351 = vst [vmem:[#allocation3 + $0x78] sm:$0xff] %v2347_v58  ;;  %v2366_v5 = vsel %vm1269_vm13, %v2357_v22, %v2359_v25 }
 0x84c   :  { %v2368_v7 = vmul.f32 %v2366_v5, %v3476_v53  ;;  %2937 = vmatpush1.bf16.msra.mxu1 %v2936_v52  ;;  %2967 = vmatprep.subr.bf16.mxu0 %v2966_v0 }
 0x84d   :  { %2969 = vmatpush1.bf16.msra.mxu0 %v2968_v31 }
 0x84e   :  { %v2363_v28 = vpop.permute.xlu1 %2362  ;;  %v2361_v33 = vpop.permute.xlu0 %2360  ;;  %v2940_v18 = vpack.c.bf16 %v2368_v7, %v3883_v60 }
 0x84f   :  { %v2367_v34 = vsel %vm1269_vm13, %v2363_v28, %v2357_v22  ;;  %v2364_v12 = vsel %vm1269_vm13, %v2361_v33, %v2363_v28  ;;  %v2365_v41 = vsel %vm1269_vm13, %v2359_v25, %v2361_v33  ;;  %v3030_v25 = vld [vmem:[#allocation3 + $0x120] sm:$0xff] }
 0x850   :  { %v2371_v36 = vmul.f32 %v2367_v34, %v3481_v61  ;;  %v2369_v56 = vmul.f32 %v2365_v41, %v3486_v1  ;;  %v2370_v53 = vmul.f32 %v2364_v12, %v3489_v2 }
 0x852   :  { %v2379_v24 = vpop.permute.xlu1 %2378  ;;  %v2377_v9 = vpop.permute.xlu0 %2376  ;;  %v2938_v42 = vpack.c.bf16 %v2369_v56, %v3885_v6  ;;  %v2970_v59 = vpack.c.bf16 %v2371_v36, %v3889_v20  ;;  %v2972_v19 = vpack.c.bf16 %v2370_v53, %v3887_v21  ;;  %v4108_v36 = vld [vmem:[#allocation15_spill] sm:$0xff] }
 0x853   :  { %v2386_v46 = vsel %vm1339_vm1, %v2377_v9, %v2379_v24 }
 0x854   :  { %v2388_v26 = vmul.f32 %v2386_v46, %v3511_v38  ;;  %2939 = vmatprep.subr.bf16.mxu1 %v2938_v42  ;;  %2971 = vmatprep.subr.bf16.mxu0 %v2970_v59 }
 0x855   :  { %2941 = vmatpush1.bf16.msra.mxu1 %v2940_v18  ;;  %2973 = vmatpush1.bf16.msra.mxu0 %v2972_v19 }
 0x856   :  { %v2383_v61 = vpop.permute.xlu1 %2382  ;;  %v2381_v1 = vpop.permute.xlu0 %2380 }
 0x857   :  { %v2387_v2 = vsel %vm1339_vm1, %v2383_v61, %v2377_v9  ;;  %v2384_v6 = vsel %vm1339_vm1, %v2381_v1, %v2383_v61  ;;  %v2385_v21 = vsel %vm1339_vm1, %v2379_v24, %v2381_v1 }
 0x858   :  { %v2391_v20 = vmul.f32 %v2387_v2, %v3516_v40  ;;  %v2389_v60 = vmul.f32 %v2385_v21, %v3521_v43  ;;  %v2390_v38 = vmul.f32 %v2384_v6, %v3524_v44 }
 0x85a   :  { %v2399_v29 = vpop.permute.xlu1 %2398  ;;  %v2397_v30 = vpop.permute.xlu0 %2396 }
 0x85b   :  { %v2406_v27 = vsel %vm1409_vm2, %v2397_v30, %v2399_v29 }
 0x85c   :  { %v2408_v15 = vmul.f32 %v2406_v27, %v3544_v17 }
 0x85e   :  { %v2403_v45 = vpop.permute.xlu1 %2402  ;;  %v2401_v39 = vpop.permute.xlu0 %2400  ;;  %v2944_v51 = vpack.c.bf16 %v2408_v15, %v2388_v26 }
 0x85f   :  { %v2407_v49 = vsel %vm1409_vm2, %v2403_v45, %v2397_v30  ;;  %v2404_v63 = vsel %vm1409_vm2, %v2401_v39, %v2403_v45  ;;  %v2405_v40 = vsel %vm1409_vm2, %v2399_v29, %v2401_v39 }
 0x860   :  { %v2411_v43 = vmul.f32 %v2407_v49, %v3549_v23  ;;  %v2409_v44 = vmul.f32 %v2405_v40, %v3554_v32  ;;  %v2410_v4 = vmul.f32 %v2404_v63, %v3557_v35 }
 0x862   :  { %v2419_v62 = vpop.permute.xlu1 %2418  ;;  %v2417_v13 = vpop.permute.xlu0 %2416  ;;  %v2942_v17 = vpack.c.bf16 %v2409_v44, %v2389_v60  ;;  %v2974_v47 = vpack.c.bf16 %v2411_v43, %v2391_v20  ;;  %v2976_v48 = vpack.c.bf16 %v2410_v4, %v2390_v38 }
 0x863   :  { %v2426_v37 = vsel %vm1479_vm6, %v2417_v13, %v2419_v62 }
 0x864   :  { %v2428_v54 = vmul.f32 %v2426_v37, %v3579_v3  ;;  %2943 = vmatprep.subr.bf16.mxu1 %v2942_v17  ;;  %2975 = vmatprep.subr.bf16.mxu0 %v2974_v47 }
 0x865   :  { %2945 = vmatpush1.bf16.msra.mxu1 %v2944_v51  ;;  %2977 = vmatpush1.bf16.msra.mxu0 %v2976_v48 }
 0x866   :  { %v2423_v23 = vpop.permute.xlu1 %2422  ;;  %v2421_v55 = vpop.permute.xlu0 %2420  ;;  %v2948_v31 = vpack.c.bf16 %v3030_v25, %v2428_v54 }
 0x867   :  { %v2427_v32 = vsel %vm1479_vm6, %v2423_v23, %v2417_v13  ;;  %v2424_v35 = vsel %vm1479_vm6, %v2421_v55, %v2423_v23  ;;  %v2425_v10 = vsel %vm1479_vm6, %v2419_v62, %v2421_v55 }
 0x868   :  { %v2431_v50 = vmul.f32 %v2427_v32, %v3584_v8  ;;  %v2429_v58 = vmul.f32 %v2425_v10, %v3589_v14  ;;  %v2430_v3 = vmul.f32 %v2424_v35, %v3592_v16 }
 0x86a   :  { %v2946_v22 = vpack.c.bf16 %v3030_v25, %v2429_v58  ;;  %v2978_v52 = vpack.c.bf16 %v3030_v25, %v2431_v50  ;;  %v2980_v0 = vpack.c.bf16 %v3030_v25, %v2430_v3 }
 0x86c   :  { %2947 = vmatprep.subr.bf16.mxu1 %v2946_v22  ;;  %2979 = vmatprep.subr.bf16.mxu0 %v2978_v52 }
 0x86d   :  { %2949 = vmatpush1.bf16.msra.mxu1 %v2948_v31  ;;  %2981 = vmatpush1.bf16.msra.mxu0 %v2980_v0 }
 0x86e   :  { %2951 = vmatprep.subr.bf16.mxu1 %v3863_v11  ;;  %2983 = vmatprep.subr.bf16.mxu0 %v3863_v11 }
 0x871   :  { %2953 = vmatpush1.bf16.msra.mxu1 %v3863_v11  ;;  %2985 = vmatpush1.bf16.msra.mxu0 %v3863_v11 }
 0x872   :  { %2955 = vmatprep.subr.bf16.mxu1 %v3863_v11  ;;  %2987 = vmatprep.subr.bf16.mxu0 %v3863_v11 }
 0x875   :  { %2957 = vmatpush1.bf16.msra.mxu1 %v3863_v11  ;;  %2989 = vmatpush1.bf16.msra.mxu0 %v3863_v11 }
 0x876   :  { %2959 = vmatprep.subr.bf16.mxu1 %v3863_v11  ;;  %2991 = vmatprep.subr.bf16.mxu0 %v3863_v11 }
 0x879   :  { %2961 = vmatpush1.bf16.msra.mxu1 %v3863_v11  ;;  %2993 = vmatpush1.bf16.msra.mxu0 %v3863_v11 }
 0x87c   :  { %2566 = vmatmul.mubr.f32.vlgmr.msra.gmra.mrb[14].mxu1 %v2436_v57  ;;  %2637 = vmatmul.mubr.f32.vlgmr.msra.gmra.mrb[12].mxu0 %v2436_v57 }
 0x94f   :  { %v2567_v8 = vpop.f32.mrb[14].mxu1  ;;  %v2638_v14 = vpop.f32.mrb[12].mxu0 }
 0x950   :  { %3021 = vtanh.f32 %v2567_v8  ;;  %v2569_v16 = vpop.f32.mrb[15].mxu1  ;;  %v2640_v5 = vpop.f32.mrb[13].mxu0 }
 0x951   :  { %3023 = vtanh.f32 %v2638_v14 }
 0x952   :  { %3025 = vtanh.f32 %v2569_v16 }
 0x953   :  { %3027 = vtanh.f32 %v2640_v5 }
 0x95a   :  { %v3022_v7 = vpop.eup %3021 }
 0x95b   :  { %v3024_v28 = vpop.eup %3023 }
 0x95c   :  { %v3026_v33 = vpop.eup %3025 }
 0x95d   :  { %v3028_v34 = vpop.eup %3027  ;;  %v2651_v12 = vcombine.low %v3022_v7, %v3026_v33 }
 0x95e   :  { %v2652_v41 = vcombine.low %v3024_v28, %v3028_v34 }
 0x95f   :  { %v2659_v56 = vrot.slane %v2651_v12, %v4108_v36 }
 0x960   :  { %v2666_v11 = vrot.slane %v2652_v41, %v4108_v36 }
 0x962   :  { %v2667_v53 = vcombine.low %v2659_v56, %v2666_v11 }
 0x964   :  { %v2674_v24 = vrot.slane %v2667_v53, %v4108_v36 }
 0x966   :  { %2676 = vst.msk [vmem:[#allocation10] sm:$0xf] %vm3321_vm3, %v2674_v24 }
 0x967   :  { %3108 = shalt.err (!%p3105_p0)
}
 0x968   :  { %s3109_s14 = scalar_lea.hbm %s4094_s6, 64 }
 0x969   :  { %p3110_p1 = scmp.ne.s32.totalorder %s4094_s6, %s3109_s14  ;;  %p3113_p2 = scmp.lt.u32.totalorder %s3109_s14, %s4094_s6 }
 0x96b   :  { %p3115_p3 = pnand %p3113_p2, %p3110_p1 }
 0x96d   :  { %3118 = shalt.err (!%p3115_p3)
}
 0x96e   :  { %2686 = dma.vmem_to_hbm [thread:$0]  %s2684_s11, 64, %s4094_s6, [#allocation6]  }
 0x96f   :  { %3123 = dma.done.wait [#allocation6], 64  }
 0x970   :  { %3124 = vsyncadd [#allocation6], 4294967232 }
 0x971   :  { %2690 = vsyncpa [#allocation5], 1 }
 0x972   :  { %2691 = vsyncpa [#allocation8], 1 }
 0x973   :  { %2692 = vsyncpa [#allocation6], 1 }

</bundles_post_ra>
